<compile_context>
chip_gen: v6e
topology: v6e:2x2x1
jax: 0.10.0
libtpu: 0.0.40
codegen_flags: <defaults>
</compile_context>

<pallas_src>
from functools import partial

import numpy as np
import jax
import jax.numpy as jnp
from jax import lax
from jax.experimental import pallas as pl
from jax.experimental.pallas import tpu as pltpu


def bn_refine_kernel(patches_ref, xres_ref, w1_ref, b_ref, w2_ref, out_ref, *,
                     K, pad, H, W):
    # patches_ref : (K*H*W, Kc)   bf16  conv1 im2col patches; chunk kx holds the
    #                                   patches centered at (h, w + kx - pad)
    # xres_ref    : (H*W, Cp)     f32   residual input (kept exact)
    # w1_ref      : (Kc, Cp)      bf16  conv1 weights (BN scale folded), im2col layout
    # b_ref       : (1, Cp)       f32   folded BN bias
    # w2_ref      : (K, K*Cp, Cp) bf16  conv2 weights, layout [kx, ky*Cp + cin, cout]
    # out_ref     : (H*W, Cp)     f32
    HW = H * W
    Cp = out_ref.shape[-1]
    f32 = jnp.float32
    bf16 = jnp.bfloat16

    def shift_h(t, dy):
        # s[h, w, :] = t[h + dy, w, :], zero outside [0, H).  Flat-row slices are
        # multiples of W rows -> tile-aligned slice + major-dim concat (vreg moves
        # only, no masks, no halo buffer).
        if dy == 0:
            return t
        z = jnp.zeros((abs(dy) * W, Cp), t.dtype)
        if dy > 0:
            return jnp.concatenate([t[dy * W:, :], z], axis=0)
        return jnp.concatenate([z, t[:(H + dy) * W, :]], axis=0)

    # column index of every flat row, for the w-boundary masks of shifted chunks
    if pad > 0:
        w_col = lax.broadcasted_iota(jnp.int32, (HW, Cp), 0) % W

    w1 = w1_ref[...]        # (Kc, Cp) bf16, grid-invariant
    bias = b_ref[...]       # (1, Cp)  f32

    acc = jnp.zeros((HW, Cp), f32)       # vreg-resident accumulator (no VMEM scratch)
    for kx in range(K):
        dx = kx - pad

        # ---- conv1 (+ folded BN + ReLU) at centers (h, w + dx): one MXU matmul ----
        p = patches_ref[kx * HW:(kx + 1) * HW, :]             # (HW, Kc) bf16
        t = jnp.dot(p, w1, preferred_element_type=f32)        # f32 accumulation
        t = jnp.maximum(t + bias, 0.0)
        if dx != 0:
            # zero the columns whose shifted center w + dx falls outside the image
            valid = (w_col >= -dx) if dx < 0 else (w_col < W - dx)
            t = jnp.where(valid, t, 0.0)
        t = t.astype(bf16)                                    # (HW, Cp)

        # ---- conv2: fold the K ky-taps into one 3*Cp-deep contraction ----
        cat = jnp.concatenate([shift_h(t, ky - pad) for ky in range(K)], axis=-1)
        acc = acc + jnp.dot(cat, w2_ref[kx], preferred_element_type=f32)

    # ---- residual add in f32, single dense lane-aligned store ----
    out_ref[...] = (acc + xres_ref[...]).astype(out_ref.dtype)


def bn_refine(x_nchw, w1, gamma, beta, rmean, rvar, w2, *, ksize, bn_eps=1e-5):
    N, C, H, W = x_nchw.shape
    K = ksize
    pad = K // 2
    HW = H * W
    Cp = ((C + 127) // 128) * 128            # lane-dense channel count (>= 128)
    KKC = K * K * C
    Kc = ((KKC + 127) // 128) * 128          # padded conv1 contraction depth
    f32 = jnp.float32
    bf16 = jnp.bfloat16

    x = jnp.transpose(x_nchw, (0, 2, 3, 1)).astype(f32)       # NHWC

    # Residual input: exact f32, channel-padded, flattened (lane-dense).
    xres = jnp.pad(x, ((0, 0), (0, 0), (0, 0), (0, Cp - C))).reshape(N, HW, Cp)

    # conv1 im2col patches for the K w-shifted center grids (wrapper glue, XLA):
    # chunk kx (rows [kx*HW, (kx+1)*HW)) = patch of x centered at (h, w + kx - pad).
    xpw = jnp.pad(x, ((0, 0), (pad, pad), (2 * pad, 2 * pad), (0, 0)))
    cols = []
    for ky in range(K):
        for kj in range(K):
            cols.append(xpw[:, ky:ky + H, kj:kj + W + 2 * pad, :])
    pext = jnp.concatenate(cols, axis=-1)                     # (N, H, W+2p, KKC)
    chunks = [pext[:, :, kx:kx + W, :].reshape(N, HW, KKC) for kx in range(K)]
    patches = jnp.concatenate(chunks, axis=1)                 # (N, K*HW, KKC)
    patches = jnp.pad(patches, ((0, 0), (0, 0), (0, Kc - KKC))).astype(bf16)

    # Fold BatchNorm (inference) into conv1: scale into output channels, bias kept.
    inv_std = 1.0 / jnp.sqrt(rvar.astype(f32) + bn_eps)
    scale = gamma.astype(f32) * inv_std
    bias = beta.astype(f32) - rmean.astype(f32) * scale

    w1f = (w1.astype(f32) * scale[None, None, None, :]).reshape(KKC, C)
    w1p = jnp.zeros((Kc, Cp), f32).at[:KKC, :C].set(w1f).astype(bf16)
    bp = jnp.zeros((1, Cp), f32).at[0, :C].set(bias)

    # conv2 weights, layout [kx, ky*Cp + cin, cout] to match the in-kernel lane concat.
    w2cat = jnp.zeros((K, K * Cp, Cp), f32)
    for ky in range(K):
        for kx in range(K):
            w2cat = w2cat.at[kx, ky * Cp:ky * Cp + C, :C].set(w2[ky, kx].astype(f32))
    w2cat = w2cat.astype(bf16)

    kern = partial(bn_refine_kernel, K=K, pad=pad, H=H, W=W)

    out_flat = pl.pallas_call(
        kern,
        out_shape=jax.ShapeDtypeStruct((N, HW, Cp), f32),
        grid=(N,),
        in_specs=[
            pl.BlockSpec((None, K * HW, Kc), lambda n: (n, 0, 0)),   # patches (per image)
            pl.BlockSpec((None, HW, Cp), lambda n: (n, 0, 0)),       # residual (per image)
            pl.BlockSpec((Kc, Cp), lambda n: (0, 0)),                # conv1 weights
            pl.BlockSpec((1, Cp), lambda n: (0, 0)),                 # folded BN bias
            pl.BlockSpec((K, K * Cp, Cp), lambda n: (0, 0, 0)),      # conv2 weights
        ],
        out_specs=pl.BlockSpec((None, HW, Cp), lambda n: (n, 0, 0)),
        compiler_params=pltpu.CompilerParams(
            dimension_semantics=("parallel",),
            vmem_limit_bytes=16 * 1024 * 1024),
    )(patches, xres, w1p, bp, w2cat)

    # back to NCHW, drop padded channels
    out = out_flat.reshape(N, H, W, Cp)[..., :C]
    return jnp.transpose(out, (0, 3, 1, 2))


def bn_refine_reference(x_nchw, w1, gamma, beta, rmean, rvar, w2, *, ksize, bn_eps=1e-5):
    """Pure-JAX reference (lax.conv) for correctness checking."""
    pad = ksize // 2
    x = jnp.transpose(x_nchw, (0, 2, 3, 1)).astype(jnp.float32)
    dn = ('NHWC', 'HWIO', 'NHWC')
    t = lax.conv_general_dilated(x, w1, (1, 1), [(pad, pad), (pad, pad)],
                                 dimension_numbers=dn)
    t = (t - rmean) / jnp.sqrt(rvar + bn_eps) * gamma + beta
    t = jnp.maximum(t, 0.0)
    t = lax.conv_general_dilated(t, w2, (1, 1), [(pad, pad), (pad, pad)],
                                 dimension_numbers=dn)
    out = t + x
    return jnp.transpose(out, (0, 3, 1, 2))


if __name__ == "__main__":
    # Small shapes consistent with BNRefine(in_planes=4, out_planes=4, ksize=3)
    N, C, H, W = 2, 4, 16, 16
    K = 3

    key = jax.random.PRNGKey(0)
    kx_, kw1, kw2, kg, kb, km, kv = jax.random.split(key, 7)

    x = jax.random.normal(kx_, (N, C, H, W), dtype=jnp.float32)

    # conv weights in HWIO layout (K, K, Cin, Cout); deterministic synthetic init
    w1 = 0.1 * jax.random.normal(kw1, (K, K, C, C), dtype=jnp.float32)
    w2 = 0.1 * jax.random.normal(kw2, (K, K, C, C), dtype=jnp.float32)

    # BatchNorm parameters / running stats (inference mode)
    gamma = 1.0 + 0.1 * jax.random.normal(kg, (C,), dtype=jnp.float32)
    beta = 0.1 * jax.random.normal(kb, (C,), dtype=jnp.float32)
    rmean = 0.1 * jax.random.normal(km, (C,), dtype=jnp.float32)
    rvar = jax.random.uniform(kv, (C,), minval=0.5, maxval=1.5, dtype=jnp.float32)

    out = bn_refine(x, w1, gamma, beta, rmean, rvar, w2, ksize=K)
    out = jax.block_until_ready(out)

    ref = bn_refine_reference(x, w1, gamma, beta, rmean, rvar, w2, ksize=K)
    ref = jax.block_until_ready(ref)

    assert out.shape == (N, C, H, W)
    # bf16 MXU operands with f32 accumulation: tolerance loosened accordingly.
    np.testing.assert_allclose(np.asarray(out), np.asarray(ref), rtol=2e-2, atol=2e-2)

    print("KERNEL_OK")
</pallas_src>

<mosaic_0001>
module attributes {stable_mosaic.version = 11 : i64} {
  func.func @bn_refine_kernel(%arg0: i32, %arg1: memref<1x768x128xbf16, #tpu.memory_space<vmem>>, %arg2: memref<1x256x128xf32, #tpu.memory_space<vmem>>, %arg3: memref<128x128xbf16, #tpu.memory_space<vmem>>, %arg4: memref<1x128xf32, #tpu.memory_space<vmem>>, %arg5: memref<3x384x128xbf16, #tpu.memory_space<vmem>>, %arg6: memref<1x256x128xf32, #tpu.memory_space<vmem>>) attributes {dimension_semantics = [#tpu.dimension_semantics<parallel>], iteration_bounds = array<i64: 2>, scalar_prefetch = 0 : i64, scratch_operands = 0 : i64, tpu.core_type = #tpu.core_type<tc>, window_params = [{transform_indices = @transform_0, window_bounds = array<i64: 1, 768, 128>}, {transform_indices = @transform_1, window_bounds = array<i64: 1, 256, 128>}, {pipeline_mode = #tpu.pipeline_mode<synchronous>, transform_indices = @transform_2, window_bounds = array<i64: 128, 128>}, {pipeline_mode = #tpu.pipeline_mode<synchronous>, transform_indices = @transform_3, window_bounds = array<i64: 1, 128>}, {pipeline_mode = #tpu.pipeline_mode<synchronous>, transform_indices = @transform_4, window_bounds = array<i64: 3, 384, 128>}, {transform_indices = @transform_5, window_bounds = array<i64: 1, 256, 128>}]} {
    %0 = tpu.iota {dimensions = array<i32: 0>} : vector<256x128xi32>
    %c16_i32 = arith.constant 16 : i32
    %c0_i32 = arith.constant 0 : i32
    %1 = arith.cmpi eq, %c16_i32, %c0_i32 : i32
    %c1_i32 = arith.constant 1 : i32
    %2 = arith.select %1, %c1_i32, %c16_i32 : i32
    %3 = vector.broadcast %2 : i32 to vector<256x128xi32>
    %4 = arith.remsi %0, %3 : vector<256x128xi32>
    %c0_i32_0 = arith.constant 0 : i32
    %5 = vector.broadcast %c0_i32_0 : i32 to vector<256x128xi32>
    %6 = arith.cmpi ne, %4, %5 : vector<256x128xi32>
    %c0_i32_1 = arith.constant 0 : i32
    %7 = vector.broadcast %c0_i32_1 : i32 to vector<256x128xi32>
    %8 = arith.cmpi slt, %4, %7 : vector<256x128xi32>
    %c0_i32_2 = arith.constant 0 : i32
    %9 = arith.cmpi slt, %2, %c0_i32_2 : i32
    %10 = vector.broadcast %9 : i1 to vector<256x128xi1>
    %11 = vector.broadcast %10 : vector<256x128xi1> to vector<256x128xi1>
    %12 = arith.xori %8, %11 : vector<256x128xi1>
    %13 = arith.andi %12, %6 : vector<256x128xi1>
    %14 = vector.broadcast %2 : i32 to vector<256x128xi32>
    %15 = arith.addi %4, %14 : vector<256x128xi32>
    %16 = arith.select %13, %15, %4 : vector<256x128xi1>, vector<256x128xi32>
    %c0 = arith.constant 0 : index
    %c0_3 = arith.constant 0 : index
    %17 = vector.load %arg3[%c0, %c0_3] : memref<128x128xbf16, #tpu.memory_space<vmem>>, vector<128x128xbf16>
    %c0_4 = arith.constant 0 : index
    %c0_5 = arith.constant 0 : index
    %18 = vector.load %arg4[%c0_4, %c0_5] : memref<1x128xf32, #tpu.memory_space<vmem>>, vector<1x128xf32>
    %cst = arith.constant 0.000000e+00 : f32
    %19 = vector.broadcast %cst : f32 to vector<256x128xf32>
    %c0_6 = arith.constant 0 : index
    %c0_7 = arith.constant 0 : index
    %c0_8 = arith.constant 0 : index
    %20 = vector.load %arg1[%c0_6, %c0_7, %c0_8] : memref<1x768x128xbf16, #tpu.memory_space<vmem>>, vector<1x256x128xbf16>
    %21 = vector.shape_cast %20 : vector<1x256x128xbf16> to vector<256x128xbf16>
    %cst_9 = arith.constant dense<0.000000e+00> : vector<256x128xf32>
    %22 = tpu.matmul %21, %17, %cst_9 {dimension_numbers = #tpu.dot_dimension_numbers<[1], [0], [0], [1], [0, 0, 1, 1], [], []>} : vector<256x128xbf16>, vector<128x128xbf16>, vector<256x128xf32> -> vector<256x128xf32>
    %23 = vector.broadcast %18 : vector<1x128xf32> to vector<256x128xf32>
    %24 = arith.addf %22, %23 : vector<256x128xf32>
    %cst_10 = arith.constant 0.000000e+00 : f32
    %25 = vector.broadcast %cst_10 : f32 to vector<256x128xf32>
    %26 = arith.maximumf %24, %25 : vector<256x128xf32>
    %c1_i32_11 = arith.constant 1 : i32
    %27 = vector.broadcast %c1_i32_11 : i32 to vector<256x128xi32>
    %28 = arith.cmpi sge, %16, %27 : vector<256x128xi32>
    %cst_12 = arith.constant 0.000000e+00 : f32
    %29 = vector.broadcast %cst_12 : f32 to vector<256x128xf32>
    %30 = arith.select %28, %26, %29 : vector<256x128xi1>, vector<256x128xf32>
    %31 = arith.truncf %30 : vector<256x128xf32> to vector<256x128xbf16>
    %cst_13 = arith.constant 0.000000e+00 : bf16
    %32 = vector.broadcast %cst_13 : bf16 to vector<16x128xbf16>
    %33 = vector.extract_strided_slice %31 {offsets = [0, 0], sizes = [240, 128], strides = [1, 1]} : vector<256x128xbf16> to vector<240x128xbf16>
    %34 = tpu.concatenate %32, %33 in 0 : vector<16x128xbf16>, vector<240x128xbf16> -> vector<256x128xbf16>
    %cst_14 = arith.constant 0.000000e+00 : bf16
    %35 = vector.broadcast %cst_14 : bf16 to vector<16x128xbf16>
    %36 = vector.extract_strided_slice %31 {offsets = [16, 0], sizes = [240, 128], strides = [1, 1]} : vector<256x128xbf16> to vector<240x128xbf16>
    %37 = tpu.concatenate %36, %35 in 0 : vector<240x128xbf16>, vector<16x128xbf16> -> vector<256x128xbf16>
    %38 = tpu.concatenate %34, %31, %37 in 1 : vector<256x128xbf16>, vector<256x128xbf16>, vector<256x128xbf16> -> vector<256x384xbf16>
    %c0_15 = arith.constant 0 : index
    %c0_16 = arith.constant 0 : index
    %c0_17 = arith.constant 0 : index
    %39 = vector.load %arg5[%c0_15, %c0_16, %c0_17] : memref<3x384x128xbf16, #tpu.memory_space<vmem>>, vector<1x384x128xbf16>
    %40 = vector.shape_cast %39 : vector<1x384x128xbf16> to vector<384x128xbf16>
    %cst_18 = arith.constant dense<0.000000e+00> : vector<256x128xf32>
    %41 = tpu.matmul %38, %40, %cst_18 {dimension_numbers = #tpu.dot_dimension_numbers<[1], [0], [0], [1], [0, 0, 1, 1], [], []>} : vector<256x384xbf16>, vector<384x128xbf16>, vector<256x128xf32> -> vector<256x128xf32>
    %42 = arith.addf %19, %41 : vector<256x128xf32>
    %c0_19 = arith.constant 0 : index
    %c256 = arith.constant 256 : index
    %c0_20 = arith.constant 0 : index
    %43 = vector.load %arg1[%c0_19, %c256, %c0_20] : memref<1x768x128xbf16, #tpu.memory_space<vmem>>, vector<1x256x128xbf16>
    %44 = vector.shape_cast %43 : vector<1x256x128xbf16> to vector<256x128xbf16>
    %cst_21 = arith.constant dense<0.000000e+00> : vector<256x128xf32>
    %45 = tpu.matmul %44, %17, %cst_21 {dimension_numbers = #tpu.dot_dimension_numbers<[1], [0], [0], [1], [0, 0, 1, 1], [], []>} : vector<256x128xbf16>, vector<128x128xbf16>, vector<256x128xf32> -> vector<256x128xf32>
    %46 = vector.broadcast %18 : vector<1x128xf32> to vector<256x128xf32>
    %47 = arith.addf %45, %46 : vector<256x128xf32>
    %cst_22 = arith.constant 0.000000e+00 : f32
    %48 = vector.broadcast %cst_22 : f32 to vector<256x128xf32>
    %49 = arith.maximumf %47, %48 : vector<256x128xf32>
    %50 = arith.truncf %49 : vector<256x128xf32> to vector<256x128xbf16>
    %cst_23 = arith.constant 0.000000e+00 : bf16
    %51 = vector.broadcast %cst_23 : bf16 to vector<16x128xbf16>
    %52 = vector.extract_strided_slice %50 {offsets = [0, 0], sizes = [240, 128], strides = [1, 1]} : vector<256x128xbf16> to vector<240x128xbf16>
    %53 = tpu.concatenate %51, %52 in 0 : vector<16x128xbf16>, vector<240x128xbf16> -> vector<256x128xbf16>
    %cst_24 = arith.constant 0.000000e+00 : bf16
    %54 = vector.broadcast %cst_24 : bf16 to vector<16x128xbf16>
    %55 = vector.extract_strided_slice %50 {offsets = [16, 0], sizes = [240, 128], strides = [1, 1]} : vector<256x128xbf16> to vector<240x128xbf16>
    %56 = tpu.concatenate %55, %54 in 0 : vector<240x128xbf16>, vector<16x128xbf16> -> vector<256x128xbf16>
    %57 = tpu.concatenate %53, %50, %56 in 1 : vector<256x128xbf16>, vector<256x128xbf16>, vector<256x128xbf16> -> vector<256x384xbf16>
    %c1 = arith.constant 1 : index
    %c0_25 = arith.constant 0 : index
    %c0_26 = arith.constant 0 : index
    %58 = vector.load %arg5[%c1, %c0_25, %c0_26] : memref<3x384x128xbf16, #tpu.memory_space<vmem>>, vector<1x384x128xbf16>
    %59 = vector.shape_cast %58 : vector<1x384x128xbf16> to vector<384x128xbf16>
    %cst_27 = arith.constant dense<0.000000e+00> : vector<256x128xf32>
    %60 = tpu.matmul %57, %59, %cst_27 {dimension_numbers = #tpu.dot_dimension_numbers<[1], [0], [0], [1], [0, 0, 1, 1], [], []>} : vector<256x384xbf16>, vector<384x128xbf16>, vector<256x128xf32> -> vector<256x128xf32>
    %61 = arith.addf %42, %60 : vector<256x128xf32>
    %c0_28 = arith.constant 0 : index
    %c512 = arith.constant 512 : index
    %c0_29 = arith.constant 0 : index
    %62 = vector.load %arg1[%c0_28, %c512, %c0_29] : memref<1x768x128xbf16, #tpu.memory_space<vmem>>, vector<1x256x128xbf16>
    %63 = vector.shape_cast %62 : vector<1x256x128xbf16> to vector<256x128xbf16>
    %cst_30 = arith.constant dense<0.000000e+00> : vector<256x128xf32>
    %64 = tpu.matmul %63, %17, %cst_30 {dimension_numbers = #tpu.dot_dimension_numbers<[1], [0], [0], [1], [0, 0, 1, 1], [], []>} : vector<256x128xbf16>, vector<128x128xbf16>, vector<256x128xf32> -> vector<256x128xf32>
    %65 = vector.broadcast %18 : vector<1x128xf32> to vector<256x128xf32>
    %66 = arith.addf %64, %65 : vector<256x128xf32>
    %cst_31 = arith.constant 0.000000e+00 : f32
    %67 = vector.broadcast %cst_31 : f32 to vector<256x128xf32>
    %68 = arith.maximumf %66, %67 : vector<256x128xf32>
    %c15_i32 = arith.constant 15 : i32
    %69 = vector.broadcast %c15_i32 : i32 to vector<256x128xi32>
    %70 = arith.cmpi slt, %16, %69 : vector<256x128xi32>
    %cst_32 = arith.constant 0.000000e+00 : f32
    %71 = vector.broadcast %cst_32 : f32 to vector<256x128xf32>
    %72 = arith.select %70, %68, %71 : vector<256x128xi1>, vector<256x128xf32>
    %73 = arith.truncf %72 : vector<256x128xf32> to vector<256x128xbf16>
    %cst_33 = arith.constant 0.000000e+00 : bf16
    %74 = vector.broadcast %cst_33 : bf16 to vector<16x128xbf16>
    %75 = vector.extract_strided_slice %73 {offsets = [0, 0], sizes = [240, 128], strides = [1, 1]} : vector<256x128xbf16> to vector<240x128xbf16>
    %76 = tpu.concatenate %74, %75 in 0 : vector<16x128xbf16>, vector<240x128xbf16> -> vector<256x128xbf16>
    %cst_34 = arith.constant 0.000000e+00 : bf16
    %77 = vector.broadcast %cst_34 : bf16 to vector<16x128xbf16>
    %78 = vector.extract_strided_slice %73 {offsets = [16, 0], sizes = [240, 128], strides = [1, 1]} : vector<256x128xbf16> to vector<240x128xbf16>
    %79 = tpu.concatenate %78, %77 in 0 : vector<240x128xbf16>, vector<16x128xbf16> -> vector<256x128xbf16>
    %80 = tpu.concatenate %76, %73, %79 in 1 : vector<256x128xbf16>, vector<256x128xbf16>, vector<256x128xbf16> -> vector<256x384xbf16>
    %c2 = arith.constant 2 : index
    %c0_35 = arith.constant 0 : index
    %c0_36 = arith.constant 0 : index
    %81 = vector.load %arg5[%c2, %c0_35, %c0_36] : memref<3x384x128xbf16, #tpu.memory_space<vmem>>, vector<1x384x128xbf16>
    %82 = vector.shape_cast %81 : vector<1x384x128xbf16> to vector<384x128xbf16>
    %cst_37 = arith.constant dense<0.000000e+00> : vector<256x128xf32>
    %83 = tpu.matmul %80, %82, %cst_37 {dimension_numbers = #tpu.dot_dimension_numbers<[1], [0], [0], [1], [0, 0, 1, 1], [], []>} : vector<256x384xbf16>, vector<384x128xbf16>, vector<256x128xf32> -> vector<256x128xf32>
    %84 = arith.addf %61, %83 : vector<256x128xf32>
    %c0_38 = arith.constant 0 : index
    %c0_39 = arith.constant 0 : index
    %c0_40 = arith.constant 0 : index
    %85 = vector.load %arg2[%c0_38, %c0_39, %c0_40] : memref<1x256x128xf32, #tpu.memory_space<vmem>>, vector<1x256x128xf32>
    %86 = vector.shape_cast %85 : vector<1x256x128xf32> to vector<256x128xf32>
    %87 = arith.addf %84, %86 : vector<256x128xf32>
    %c0_41 = arith.constant 0 : index
    %c0_42 = arith.constant 0 : index
    %c0_43 = arith.constant 0 : index
    %88 = vector.load %arg6[%c0_41, %c0_42, %c0_43] : memref<1x256x128xf32, #tpu.memory_space<vmem>>, vector<1x256x128xf32>
    %89 = vector.shape_cast %88 : vector<1x256x128xf32> to vector<256x128xf32>
    %90 = vector.shape_cast %87 : vector<256x128xf32> to vector<1x256x128xf32>
    tpu.vector_store %arg6[%c0_41, %c0_42, %c0_43], %90 {strides = array<i32>} : memref<1x256x128xf32, #tpu.memory_space<vmem>>, vector<1x256x128xf32>,
    return
  }
  func.func @transform_0(%arg0: i32) -> (i32, i32, i32) {
    %c0_i32 = arith.constant 0 : i32
    %c0_i32_0 = arith.constant 0 : i32
    %c0_i32_1 = arith.constant 0 : i32
    return %arg0, %c0_i32, %c0_i32_0 : i32, i32, i32
  }
  func.func @transform_1(%arg0: i32) -> (i32, i32, i32) {
    %c0_i32 = arith.constant 0 : i32
    %c0_i32_0 = arith.constant 0 : i32
    %c0_i32_1 = arith.constant 0 : i32
    return %arg0, %c0_i32, %c0_i32_0 : i32, i32, i32
  }
  func.func @transform_2(%arg0: i32) -> (i32, i32) {
    %c0_i32 = arith.constant 0 : i32
    %c0_i32_0 = arith.constant 0 : i32
    %c0_i32_1 = arith.constant 0 : i32
    return %c0_i32, %c0_i32_0 : i32, i32
  }
  func.func @transform_3(%arg0: i32) -> (i32, i32) {
    %c0_i32 = arith.constant 0 : i32
    %c0_i32_0 = arith.constant 0 : i32
    %c0_i32_1 = arith.constant 0 : i32
    return %c0_i32, %c0_i32_0 : i32, i32
  }
  func.func @transform_4(%arg0: i32) -> (i32, i32, i32) {
    %c0_i32 = arith.constant 0 : i32
    %c0_i32_0 = arith.constant 0 : i32
    %c0_i32_1 = arith.constant 0 : i32
    %c0_i32_2 = arith.constant 0 : i32
    return %c0_i32, %c0_i32_0, %c0_i32_1 : i32, i32, i32
  }
  func.func @transform_5(%arg0: i32) -> (i32, i32, i32) {
    %c0_i32 = arith.constant 0 : i32
    %c0_i32_0 = arith.constant 0 : i32
    %c0_i32_1 = arith.constant 0 : i32
    return %arg0, %c0_i32, %c0_i32_0 : i32, i32, i32
  }
}

</mosaic_0001>

<bundles_post_ra>
// kernel: tpu_custom_call.1
= control target key start
LH: loop header
LB: loop body
LE: loop exit
PB: predicated region body
PF: predicated region fallthrough
CT: control target
= control target key end

     0   :  { %s6720_s0 = inlined_call_operand.hbm [shape: bf16[2,768,128], index: 0, kind: input, shape index: {}]   ;;  %s6721_s1 = inlined_call_operand.hbm [shape: f32[2,256,128], index: 1, kind: input, shape index: {}]   ;;  %s6722_s2 = inlined_call_operand.hbm [shape: bf16[128,128], index: 2, kind: input, shape index: {}]   ;;  %s6723_s3 = inlined_call_operand.vmem [shape: f32[1,128], index: 3, kind: input, shape index: {}]   ;;  %s6724_s4 = inlined_call_operand.hbm [shape: bf16[3,384,128], index: 4, kind: input, shape index: {}]   ;;  %s6725_s5 = inlined_call_operand.hbm [shape: f32[2,256,128], index: 5, kind: output, shape index: {}]  }
   0x1   :  { %6731 = sst [smem:[#allocation16_spill]] %s6720_s0 }
   0x2   :  { %6732 = sst [smem:[#allocation17_spill]] %s6722_s2 }
   0x3   :  { %6733 = sst [smem:[#allocation18_spill]] %s6724_s4 }
   0x4   :  { %10 = vsyncpa [#allocation3], 0 }
   0x5   :  { %12 = vsyncpa [#allocation3 + $0x1], 0 }
   0x6   :  { %13 = vsyncpa [#allocation6], 0 }
   0x7   :  { %15 = vsyncpa [#allocation6 + $0x1], 0 }
   0x8   :  { %16 = vsyncpa [#allocation9], 0 }
   0x9   :  { %17 = vsyncpa [#allocation4], 0 }
   0xa   :  { %19 = vsyncpa [#allocation4 + $0x1], 0  ;;  %s5384_s18 = smov 0   ;;  %s5386_s19 = smov 0  }
   0xb   :  { %s5388_s20 = smov 0   ;;  %s5390_s21 = smov 0  }
   0xc LB: > { %s5405_s22 = sadd.s32 4294967295, %s5339_s21   ;;  %s3741_s23 = sadd.s32 4294967294, %s5339_s21   ;;  %s5339_s21 = sphi %s5390_s21, %s6821_s21   ;;  %s5335_s20 = sphi %s5388_s20, %s6820_s20   ;;  %s5331_s19 = sphi %s5386_s19, %s6819_s19   ;;  %s5327_s18 = sphi %s5384_s18, %s6818_s18  }
   0xd   : > { %p45_p0 = scmp.ne.s32.totalorder %s5331_s19, %s5327_s18  ;;  %p6727_p1 = scmp.eq.s32.totalorder %s5405_s22, 0 }
   0xe   : > { %p158_p2 = scmp.eq.s32.totalorder %s5405_s22, 1  ;;  %p164_p3 = scmp.eq.s32.totalorder %s3741_s23, 1 }
   0xf   : > { %p5414_p4 = por %p6727_p1, %p45_p0  ;;  %p3742_p5 = scmp.ge.s32.totalorder %s5339_s21, 1 }
  0x10   : > { %p5419_p6 = por %p164_p3, %p45_p0  ;;  %p171_p7 = scmp.lt.s32.totalorder %s5339_s21, 3 }
  0x11   : > { %s6734_s24 = scalar_select %p5414_p4, 1, 0 }
  0x12   : > { %s6735_s25 = scalar_select %p5419_p6, 1, 0 }
  0x13   : > { %p5424_p8 = pnand %p3742_p5, %p171_p7  ;;  %s5341_s27 = smov [#allocation7]  }
  0x14   : > { %s183_s28 = sshll.u32 %s5341_s27, 4  ;;  %s5342_s30 = smov [#allocation8]   ;;  %s184_s28 = int_to_ptr.vmem [resolvable:$true] %s183_s28 }
  0x15   : > { %p4952_p9 = pneg %p5424_p8  ;;  %s199_s6 = sshll.u32 %s5342_s30, 4  ;;  %s200_s6 = int_to_ptr.vmem [resolvable:$true] %s199_s6 }
  0x16   : > { %s5166_s7 = scalar_lea.vmem %s184_s28, 1024  ;;  %p5174_p5 = scmp.lt.s32.totalorder %s184_s28, %s184_s28 }
  0x17   : > { %p5433_p11 = pnand %p4952_p9, %p6727_p1  ;;  %p5167_p13 = scmp.ne.s32.totalorder %s184_s28, %s5166_s7 }
  0x18   : > { %p5175_p7 = scmp.lt.s32.totalorder %s5166_s7, %s5166_s7 }
  0x19   : > { %p5157_p12 = pneg %p5433_p11 }
  0x1a   : > { %p5176_p10 = por %p5175_p7, %p5174_p5 }
  0x1b   : > { %p5169_p0 = pnand %p5167_p13, %p5157_p12 }
  0x1d   : > { %p5170_p3 = pneg %p5169_p0 }
  0x1f   : > { %p5177_p9 = pnand %p5176_p10, %p5170_p3 }
  0x21   : > { %5180 = shalt.err (!%p5177_p9)
}
  0x22   : > { %s6726_s8 = smov 64   ;;  %s5344_s9 = smov 4  }
  0x23   : > { %s6738_s2 = sld [smem:[#allocation17_spill]]  ;;  %s5192_s12 = scalar_lea.vmem %s200_s6, 9216 }
  0x24   : > { %p5193_p13 = scmp.ne.s32.totalorder %s200_s6, %s5192_s12  ;;  %p5200_p10 = scmp.lt.s32.totalorder %s200_s6, %s200_s6 }
  0x25   : > { %p5201_p3 = scmp.lt.s32.totalorder %s5192_s12, %s5192_s12 }
  0x26   : > { %p5195_p0 = pnand %p5193_p13, %p5157_p12 }
  0x27   : > { %p5202_p7 = por %p5201_p3, %p5200_p10 }
  0x28   : > { %p5196_p5 = pneg %p5195_p0 }
  0x29   : > { %4955 = dma.hbm_to_vmem [thread:$0]  (!%p5433_p11), %s6738_s2, 1024, %s184_s28, [#allocation6], %s6726_s8, %s6726_s8, %s5344_s9  }
  0x2a   : > { %p5203_p9 = pnand %p5202_p7, %p5196_p5 }
  0x2c   : > { %5206 = shalt.err (!%p5203_p9)
}
  0x2d   : > { %s6739_s4 = sld [smem:[#allocation18_spill]]  ;;  %s5462_s15 = sadd.s32 1, %s5339_s21  }
  0x2e   : > { %s32_s16 = sadd.s32 1, %s5335_s20  ;;  %s29_s17 = ssub.s32 %s5339_s21, %s5462_s15 }
  0x2f   : > { %p39_p12 = scmp.ne.s32.totalorder %s5335_s20, %s5331_s19  ;;  %p30_p13 = scmp.eq.s32.totalorder %s29_s17, 0 }
  0x30   : > { %p40_p0 = scmp.eq.s32.totalorder %s5339_s21, 0  ;;  %p4972_p10 = scmp.lt.s32.totalorder %s5339_s21, 2 }
  0x31   : > { %p5472_p5 = por %p158_p2, %p39_p12  ;;  %s5481_s28 = sand.u32 1, %s5335_s20  }
  0x32   : > { %s5478_s27 = scalar_select %p30_p13, %s5335_s20, %s32_s16  }
  0x33   : > { %4958 = dma.hbm_to_vmem [thread:$0]  (!%p5433_p11), %s6739_s4, 9216, %s200_s6, [#allocation9], %s6726_s8, %s6726_s8, %s5344_s9  }
  0x34   : > { %s6740_s23 = scalar_select %p5472_p5, 1, 0 }
  0x35   : > { %p41_p3 = por %p40_p0, %p39_p12  ;;  %s4935_s29 = smul.u32 384, %s5481_s28 }
  0x36   : > { %s4936_s30 = smul.u32 6144, %s5339_s21  ;;  %s6742_s0 = sld [smem:[#allocation16_spill]] }
  0x37   : > { %p5485_p11 = pnand %p4972_p10, %p41_p3  ;;  %s217_s13 = scalar_lea.vmem [#allocation2], %s4935_s29 }
  0x38   : > { %s224_s14 = sshll.u32 %s217_s13, 4  ;;  %s214_s16 = scalar_lea.sflag [#allocation3], %s5481_s28  ;;  %s5495_s14 = int_to_ptr.vmem [resolvable:$true] %s224_s14 }
  0x39   : > { %p5209_p7 = pneg %p5485_p11 }
  0x3c   : > { %s5493_s12 = scalar_lea.hbm %s6742_s0, %s4936_s30  ;;  %s5212_s30 = scalar_lea.hbm %s6742_s0, 12288 }
  0x3d   : > { %s5207_s17 = scalar_lea.hbm %s5493_s12, 6144  ;;  %p5213_p13 = scmp.lt.s32.totalorder %s5493_s12, %s6742_s0 }
  0x3e   : > { %p5208_p2 = scmp.ne.s32.totalorder %s5493_s12, %s5207_s17  ;;  %p5214_p0 = scmp.lt.s32.totalorder %s5212_s30, %s5207_s17 }
  0x40   : > { %p5210_p9 = pnand %p5209_p7, %p5208_p2  ;;  %p5215_p10 = por %p5214_p0, %p5213_p13 }
  0x42   : > { %p5211_p12 = pneg %p5210_p9 }
  0x44   : > { %p5216_p3 = pnand %p5215_p10, %p5211_p12 }
  0x46   : > { %5219 = shalt.err (!%p5216_p3)
}
  0x47   : > { %s5220_s29 = scalar_lea.vmem %s5495_s14, 6144  ;;  %s5345_s7 = smov [#allocation2]  }
  0x48   : > { %p5221_p1 = scmp.ne.s32.totalorder %s5495_s14, %s5220_s29  ;;  %s5225_s13 = sshll.u32 %s5345_s7, 4  ;;  %s5226_s13 = int_to_ptr.vmem [resolvable:$false] %s5225_s13 }
  0x49   : > { %s5227_s10 = scalar_lea.vmem %s5226_s13, 12288  ;;  %p5228_p6 = scmp.lt.s32.totalorder %s5495_s14, %s5226_s13 }
  0x4a   : > { %p5223_p2 = pnand %p5221_p1, %p5209_p7  ;;  %p5229_p5 = scmp.lt.s32.totalorder %s5227_s10, %s5220_s29 }
  0x4c   : > { %p5224_p9 = pneg %p5223_p2  ;;  %p5230_p4 = por %p5229_p5, %p5228_p6 }
  0x4e   : > { %p5231_p13 = pnand %p5230_p4, %p5224_p9 }
  0x50   : > { %5234 = shalt.err (!%p5231_p13)
}
  0x51   : > { %s6743_s8 = smov 64   ;;  %s3747_s17 = sshll.u32 %s5481_s28, 8 }
  0x52   : > { %4962 = dma.hbm_to_vmem [thread:$0]  (!%p5485_p11), %s5493_s12, 6144, %s5495_s14, %s214_s16, %s6743_s8, %s6743_s8, %s5344_s9  }
  0x53   : > { %s4165_s30 = sshll.u32 %s5339_s21, 12  ;;  %s238_s13 = scalar_lea.vmem [#allocation5], %s3747_s17 }
  0x54   : > { %s5532_s7 = scalar_lea.hbm %s6721_s1, %s4165_s30  ;;  %s245_s10 = sshll.u32 %s238_s13, 4  ;;  %s5534_s10 = int_to_ptr.vmem [resolvable:$true] %s245_s10 }
  0x55   : > { %s6744_s0 = sand.u32 1, %s5339_s21   ;;  %s5235_s4 = scalar_lea.hbm %s5532_s7, 4096 }
  0x56   : > { %s5538_s2 = scalar_lea.sflag [#allocation6], %s6744_s0  ;;  %p5236_p1 = scmp.ne.s32.totalorder %s5532_s7, %s5235_s4 }
  0x57   : > { %s5240_s12 = scalar_lea.hbm %s6721_s1, 8192  ;;  %p5241_p5 = scmp.lt.s32.totalorder %s5532_s7, %s6721_s1 }
  0x58   : > { %p5238_p4 = pnand %p5236_p1, %p5209_p7  ;;  %p5242_p12 = scmp.lt.s32.totalorder %s5240_s12, %s5235_s4 }
  0x5a   : > { %p5239_p6 = pneg %p5238_p4  ;;  %p5243_p0 = por %p5242_p12, %p5241_p5 }
  0x5c   : > { %p5244_p10 = pnand %p5243_p0, %p5239_p6 }
  0x5e   : > { %5247 = shalt.err (!%p5244_p10)
}
  0x5f   : > { %s5248_s0 = scalar_lea.vmem %s5534_s10, 4096  ;;  %s5346_s8 = smov [#allocation5]  }
  0x60   : > { %p5249_p3 = scmp.ne.s32.totalorder %s5534_s10, %s5248_s0  ;;  %s5253_s17 = sshll.u32 %s5346_s8, 4  ;;  %s5254_s17 = int_to_ptr.vmem [resolvable:$false] %s5253_s17 }
  0x61   : > { %s5255_s30 = scalar_lea.vmem %s5254_s17, 8192  ;;  %p5256_p13 = scmp.lt.s32.totalorder %s5534_s10, %s5254_s17 }
  0x62   : > { %p5251_p2 = pnand %p5249_p3, %p5209_p7  ;;  %p5257_p1 = scmp.lt.s32.totalorder %s5255_s30, %s5248_s0 }
  0x64   : > { %p5252_p9 = pneg %p5251_p2  ;;  %p5258_p4 = por %p5257_p1, %p5256_p13 }
  0x66   : > { %p5259_p5 = pnand %p5258_p4, %p5252_p9 }
  0x68   : > { %5262 = shalt.err (!%p5259_p5)
}
  0x69   : > { %s5347_s4 = smov 128   ;;  %s5348_s11 = smov 8  }
  0x6a   : > { %4965 = dma.hbm_to_vmem [thread:$0]  (!%p5485_p11), %s5532_s7, 4096, %s5534_s10, %s5538_s2, %s5347_s4, %s5347_s4, %s5348_s11  }
  0x6b   : > { %257 = sbr.rel (%p5424_p8) target bundleno = 1100 (0x44c), region = 40  ;;  %s5566_s29 = sand.u32 (!%p5424_p8), 1, %s5331_s19  }
  0x6c   : > { %s4937_s13 = smul.u32 (!%p5424_p8), 384, %s5566_s29  ;;  %s260_s9 = scalar_lea.sflag (!%p5424_p8), [#allocation3], %s5566_s29 }
  0x6d   : > { %p6745_p7 = scmp.ne.s32.totalorder (!%p5424_p8), %s6734_s24, 0 }
  0x6e   : > { %s5570_s28 = scalar_lea.vmem (!%p5424_p8), [#allocation2], %s4937_s13 }
  0x70   : > { %5306 = dma.done.wait (%p6745_p7), %s260_s9, 6144  }
  0x71   : > { %5308 = vsyncadd (%p6745_p7), %s260_s9, 4294961152  ;;  %s268_s2 = sand.u32 1, %s5405_s22   ;;  %s3751_s26 = sshll.u32 %s5566_s29, 8 }
  0x72   : > { %s269_s6 = scalar_lea.sflag [#allocation6], %s268_s2  ;;  %s5580_s7 = scalar_lea.vmem [#allocation5], %s3751_s26 }
  0x73   : > { %5310 = dma.done.wait (%p6745_p7), %s269_s6, 4096  }
  0x74   : > { %5312 = vsyncadd (%p6745_p7), %s269_s6, 4294963200  ;;  %p6746_p8 = scmp.eq.s32.totalorder %s5405_s22, 0 }
  0x76   : > { %5314 = dma.done.wait (%p6746_p8), [#allocation6], 1024   ;;  %p6747_p11 = pmov %p6746_p8 }
  0x77   : > { %p6748_p6 = pmov %p6746_p8 }
  0x78   : > { %5316 = vsyncadd (%p6747_p11), [#allocation6], 4294966272 }
  0x79   : > { %5318 = dma.done.wait (%p6748_p6), [#allocation9], 9216   ;;  %p6749_p12 = pmov %p6748_p6 }
  0x7a   : > { %v5018_v0 = vld [vmem:[#allocation7 + $0x38] sm:$0xff]   ;;  %v5019_v1 = vld [vmem:[#allocation7 + $0x30] sm:$0xff]   ;;  %v5020_v2 = vld [vmem:[#allocation7 + $0x28] sm:$0xff]   ;;  %vm5350_vm1 = vmmov 1   ;;  %s6577_s16 = scalar_lea.vmem [#allocation10], %s3751_s26  ;;  %s4166_s0 = sshll.u32 %s5405_s22, 12 }
  0x7b   : > { %5320 = vsyncadd (%p6749_p12), [#allocation9], 4294958080  ;;  %4695 = vmatprep.subr.bf16.mxu1 %v5018_v0  ;;  %4647 = vmatprep.subr.bf16.mxu0 %v5018_v0  ;;  %v5021_v3 = vld [vmem:[#allocation7 + $0x20] sm:$0xff]   ;;  %v5022_v5 = vld [vmem:[#allocation7 + $0x18] sm:$0xff]   ;;  %s3626_s8 = sshll.u32 %s6577_s16, 4  ;;  %s6674_s4 = scalar_lea.hbm %s6725_s5, %s4166_s0  ;;  %s6676_s8 = int_to_ptr.vmem [resolvable:$true] %s3626_s8 }
  0x7c   : > { %4696 = vmatpush3.bf16.msra.mxu1 %v5018_v0  ;;  %4648 = vmatpush3.bf16.msra.mxu0 %v5018_v0  ;;  %v5026_v4 = vld [vmem:[%s5570_s28 + $0x80] sm:$0xff]   ;;  %v5023_v6 = vld [vmem:[#allocation7 + $0x10] sm:$0xff]   ;;  %v5024_v7 = vld [vmem:[#allocation7 + $0x8] sm:$0xff]   ;;  %s3613_s11 = scalar_lea.sflag [#allocation4], %s5566_s29  ;;  %s5263_s13 = scalar_lea.vmem %s6676_s8, 4096 }
  0x7d   : > { %4697 = vmatprep.subr.bf16.mxu1 %v5019_v1  ;;  %4649 = vmatprep.subr.bf16.mxu0 %v5019_v1  ;;  %v5025_v8 = vld [vmem:[#allocation7] sm:$0xff]   ;;  %v5027_v10 = vld [vmem:[%s5570_s28 + $0x88] sm:$0xff]   ;;  %v5028_v11 = vld [vmem:[%s5570_s28 + $0x90] sm:$0xff]   ;;  %p5264_p0 = scmp.ne.s32.totalorder %s6676_s8, %s5263_s13  ;;  %p6815_p10 = scmp.ne.s32.totalorder %s6740_s23, 0 }
  0x7e   : > { %4711 = vmatprep.mubr.bf16.mxu1 %v5026_v4  ;;  %v5042_v9 = vld [vmem:[%s5570_s28] sm:$0xff]   ;;  %v5043_v12 = vld [vmem:[%s5570_s28 + $0x8] sm:$0xff]   ;;  %v5044_v13 = vld [vmem:[%s5570_s28 + $0x10] sm:$0xff]   ;;  %s5351_s22 = smov [#allocation10]  }
  0x7f   : > { %4663 = vmatprep.mubr.bf16.mxu0 %v5042_v9  ;;  %v5052_v14 = vld [vmem:[#allocation8 + $0x138] sm:$0xff]   ;;  %v5054_v17 = vld [vmem:[#allocation8 + $0x130] sm:$0xff]   ;;  %v5030_v18 = vld [vmem:[%s5570_s28 + $0xa0] sm:$0xff]   ;;  %p5265_p3 = pnand %p5264_p0, %p6815_p10  ;;  %s5267_s9 = sshll.u32 %s5351_s22, 4  ;;  %s5268_s9 = int_to_ptr.vmem [resolvable:$false] %s5267_s9 }
  0x80   : > { %4698 = vmatpush3.bf16.msra.mxu1 %v5019_v1  ;;  %4650 = vmatpush3.bf16.msra.mxu0 %v5019_v1  ;;  %v5053_v15 = vld [vmem:[#allocation8 + $0xf8] sm:$0xff]   ;;  %v5056_v20 = vld [vmem:[#allocation8 + $0xf0] sm:$0xff]   ;;  %v5046_v21 = vld [vmem:[%s5570_s28 + $0x20] sm:$0xff]   ;;  %p5270_p9 = scmp.lt.s32.totalorder %s6676_s8, %s5268_s9 }
  0x81   : > { %4699 = vmatprep.subr.bf16.mxu1 %v5020_v2  ;;  %4651 = vmatprep.subr.bf16.mxu0 %v5020_v2  ;;  %v5029_v16 = vld [vmem:[%s5570_s28 + $0x98] sm:$0xff]   ;;  %v5058_v22 = vld [vmem:[#allocation8 + $0x128] sm:$0xff]   ;;  %v5062_v25 = vld [vmem:[#allocation8 + $0x120] sm:$0xff]   ;;  %p5266_p2 = pneg %p5265_p3 }
  0x82   : > { %v5045_v19 = vld [vmem:[%s5570_s28 + $0x18] sm:$0xff]   ;;  %v5059_v23 = vld [vmem:[#allocation8 + $0xe8] sm:$0xff]   ;;  %v5032_v26 = vld [vmem:[%s5570_s28 + $0xb0] sm:$0xff]  }
  0x83   : > { %v5031_v24 = vld [vmem:[%s5570_s28 + $0xa8] sm:$0xff]   ;;  %v5063_v27 = vld [vmem:[#allocation8 + $0xe0] sm:$0xff]   ;;  %v5048_v29 = vld [vmem:[%s5570_s28 + $0x30] sm:$0xff]  }
  0x84   : > { %4700 = vmatpush3.bf16.msra.mxu1 %v5020_v2  ;;  %4652 = vmatpush3.bf16.msra.mxu0 %v5020_v2  ;;  %v5047_v28 = vld [vmem:[%s5570_s28 + $0x28] sm:$0xff]   ;;  %v5066_v30 = vld [vmem:[#allocation8 + $0x118] sm:$0xff]   ;;  %v5068_v32 = vld [vmem:[#allocation8 + $0x110] sm:$0xff]  }
  0x85   : > { %4701 = vmatprep.subr.bf16.mxu1 %v5021_v3  ;;  %4653 = vmatprep.subr.bf16.mxu0 %v5021_v3  ;;  %v5067_v31 = vld [vmem:[#allocation8 + $0xd8] sm:$0xff]   ;;  %v5070_v36 = vld [vmem:[#allocation8 + $0xd0] sm:$0xff]   ;;  %v5034_v37 = vld [vmem:[%s5570_s28 + $0xc0] sm:$0xff]  }
  0x86   : > { %v5069_v33 = vld [vmem:[#allocation8 + $0x178] sm:$0xff]   ;;  %v5071_v38 = vld [vmem:[#allocation8 + $0x170] sm:$0xff]   ;;  %v5050_v39 = vld [vmem:[%s5570_s28 + $0x40] sm:$0xff]  }
  0x87   : > { %v5033_v34 = vld [vmem:[%s5570_s28 + $0xb8] sm:$0xff]   ;;  %v5072_v40 = vld [vmem:[#allocation8 + $0x108] sm:$0xff]   ;;  %v5036_v45 = vld [vmem:[%s5570_s28 + $0xd0] sm:$0xff]  }
  0x88   : > { %4702 = vmatpush3.bf16.msra.mxu1 %v5021_v3  ;;  %4654 = vmatpush3.bf16.msra.mxu0 %v5021_v3  ;;  %v5049_v35 = vld [vmem:[%s5570_s28 + $0x38] sm:$0xff]   ;;  %v5073_v41 = vld [vmem:[#allocation8 + $0x168] sm:$0xff]   ;;  %v5055_v46 = vld [vmem:[%s5570_s28 + $0x50] sm:$0xff]  }
  0x89   : > { %4703 = vmatprep.subr.bf16.mxu1 %v5022_v5  ;;  %4655 = vmatprep.subr.bf16.mxu0 %v5022_v5  ;;  %v5074_v42 = vld [vmem:[#allocation8 + $0xc8] sm:$0xff]   ;;  %v5037_v47 = vld [vmem:[%s5570_s28 + $0xd8] sm:$0xff]   ;;  %v5038_v49 = vld [vmem:[%s5570_s28 + $0xe0] sm:$0xff]  }
  0x8a   : > { %v5035_v43 = vld [vmem:[%s5570_s28 + $0xc8] sm:$0xff]   ;;  %v5057_v48 = vld [vmem:[%s5570_s28 + $0x58] sm:$0xff]   ;;  %v5060_v50 = vld [vmem:[%s5570_s28 + $0x60] sm:$0xff]  }
  0x8b   : > { %v5051_v44 = vld [vmem:[%s5570_s28 + $0x48] sm:$0xff]   ;;  %v5040_v53 = vld [vmem:[%s5570_s28 + $0xf0] sm:$0xff]   ;;  %v5041_v55 = vld [vmem:[%s5570_s28 + $0xf8] sm:$0xff]  }
  0x8c   : > { %4704 = vmatpush3.bf16.msra.mxu1 %v5022_v5  ;;  %4656 = vmatpush3.bf16.msra.mxu0 %v5022_v5  ;;  %v5039_v51 = vld [vmem:[%s5570_s28 + $0xe8] sm:$0xff]   ;;  %v5064_v54 = vld [vmem:[%s5570_s28 + $0x70] sm:$0xff]   ;;  %v5065_v56 = vld [vmem:[%s5570_s28 + $0x78] sm:$0xff]  }
  0x8d   : > { %4705 = vmatprep.subr.bf16.mxu1 %v5023_v6  ;;  %4657 = vmatprep.subr.bf16.mxu0 %v5023_v6  ;;  %v5061_v52 = vld [vmem:[%s5570_s28 + $0x68] sm:$0xff]   ;;  %v5075_v57 = vld [vmem:[#allocation8 + $0x160] sm:$0xff]   ;;  %v5077_v58 = vld [vmem:[#allocation8 + $0x158] sm:$0xff]  }
  0x8e   : > { %v5079_v59 = vld [vmem:[#allocation8 + $0x150] sm:$0xff]   ;;  %v5076_v60 = vld [vmem:[#allocation8 + $0x100] sm:$0xff]   ;;  %v5080_v62 = vld [vmem:[#allocation8 + $0x148] sm:$0xff]  }
  0x8f   : > { %v5078_v61 = vld [vmem:[#allocation8 + $0xc0] sm:$0xff]   ;;  %v5081_v0 = vld [vmem:[#allocation8 + $0xb8] sm:$0xff]  }
  0x90   : > { %4706 = vmatpush3.bf16.msra.mxu1 %v5023_v6  ;;  %4658 = vmatpush3.bf16.msra.mxu0 %v5023_v6  ;;  %v5082_v63 = vld [vmem:[#allocation8 + $0x140] sm:$0xff]   ;;  %v5085_v1 = vld [vmem:[#allocation8 + $0x78] sm:$0xff]  }
  0x91   : > { %4707 = vmatprep.subr.bf16.mxu1 %v5024_v7  ;;  %4659 = vmatprep.subr.bf16.mxu0 %v5024_v7  ;;  %v5629_v2 = vld [vmem:[%s6723_s3] ss:$0 sm:$0xff] }
  0x94   : > { %4708 = vmatpush3.bf16.msra.mxu1 %v5024_v7  ;;  %4660 = vmatpush3.bf16.msra.mxu0 %v5024_v7 }
  0x95   : > { %4709 = vmatprep.subr.bf16.mxu1 %v5025_v8  ;;  %4661 = vmatprep.subr.bf16.mxu0 %v5025_v8 }
  0x98   : > { %4710 = vmatpush3.bf16.msra.mxu1 %v5025_v8  ;;  %4662 = vmatpush3.bf16.msra.mxu0 %v5025_v8 }
  0x99   : > { %4215 = vmatprep.subr.bf16.mxu0 %v5052_v14  ;;  %4743 = vmatprep.subr.bf16.mxu1 %v5069_v33 }
  0x9b   : > { %4712 = vmatmul.mubr.bf16.vlgmr.msra.gmra.mxu1 %v5027_v10  ;;  %4664 = vmatmul.mubr.bf16.vlgmr.msra.gmra.mxu0 %v5043_v12 }
  0x9c   : > { %4715 = vmatprep.mubr.bf16.mxu1 %v5028_v11  ;;  %4667 = vmatprep.mubr.bf16.mxu0 %v5044_v13 }
  0x9d   : > { %4216 = vmatpush3.bf16.msra.mxu0 %v5053_v15  ;;  %4744 = vmatpush3.bf16.msra.mxu1 %v5069_v33 }
  0x9e   : > { %4217 = vmatprep.subr.bf16.mxu0 %v5054_v17  ;;  %4745 = vmatprep.subr.bf16.mxu1 %v5071_v38 }
  0xa1   : > { %4218 = vmatpush3.bf16.msra.mxu0 %v5056_v20  ;;  %4746 = vmatpush3.bf16.msra.mxu1 %v5071_v38 }
  0xa2   : > { %4219 = vmatprep.subr.bf16.mxu0 %v5058_v22  ;;  %4747 = vmatprep.subr.bf16.mxu1 %v5073_v41  ;;  %v5083_v22 = vld [vmem:[#allocation8 + $0xb0] sm:$0xff]  }
  0xa3   : > { %4716 = vmatmul.mubr.bf16.gmra.mxu1 %v5029_v16  ;;  %4668 = vmatmul.mubr.bf16.gmra.mxu0 %v5045_v19 }
  0xa4   : > { %4719 = vmatprep.mubr.bf16.mxu1 %v5030_v18  ;;  %4671 = vmatprep.mubr.bf16.mxu0 %v5046_v21 }
  0xa5   : > { %4220 = vmatpush3.bf16.msra.mxu0 %v5059_v23  ;;  %4748 = vmatpush3.bf16.msra.mxu1 %v5073_v41 }
  0xa6   : > { %4221 = vmatprep.subr.bf16.mxu0 %v5062_v25  ;;  %4749 = vmatprep.subr.bf16.mxu1 %v5075_v57 }
  0xa9   : > { %4222 = vmatpush3.bf16.msra.mxu0 %v5063_v27  ;;  %4750 = vmatpush3.bf16.msra.mxu1 %v5075_v57 }
  0xaa   : > { %4223 = vmatprep.subr.bf16.mxu0 %v5066_v30  ;;  %4751 = vmatprep.subr.bf16.mxu1 %v5077_v58 }
  0xab   : > { %4720 = vmatmul.mubr.bf16.gmra.mxu1 %v5031_v24  ;;  %4672 = vmatmul.mubr.bf16.gmra.mxu0 %v5047_v28 }
  0xac   : > { %4723 = vmatprep.mubr.bf16.mxu1 %v5032_v26  ;;  %4675 = vmatprep.mubr.bf16.mxu0 %v5048_v29  ;;  %v6730_v26 = vmov 0  }
  0xad   : > { %4224 = vmatpush3.bf16.msra.mxu0 %v5067_v31  ;;  %4752 = vmatpush3.bf16.msra.mxu1 %v5077_v58  ;;  %v5084_v31 = vld [vmem:[#allocation8 + $0xa8] sm:$0xff]  }
  0xae   : > { %4225 = vmatprep.subr.bf16.mxu0 %v5068_v32  ;;  %4753 = vmatprep.subr.bf16.mxu1 %v5079_v59 }
  0xb1   : > { %4226 = vmatpush3.bf16.msra.mxu0 %v5070_v36  ;;  %4754 = vmatpush3.bf16.msra.mxu1 %v5079_v59  ;;  %v5091_v59 = vld [vmem:[#allocation8 + $0x28] sm:$0xff]  }
  0xb2   : > { %4227 = vmatprep.subr.bf16.mxu0 %v5072_v40  ;;  %4755 = vmatprep.subr.bf16.mxu1 %v5080_v62  ;;  %v5090_v40 = vld [vmem:[#allocation8 + $0xa0] sm:$0xff]  }
  0xb3   : > { %4724 = vmatmul.mubr.bf16.gmra.mxu1 %v5033_v34  ;;  %4676 = vmatmul.mubr.bf16.gmra.mxu0 %v5049_v35 }
  0xb4   : > { %4727 = vmatprep.mubr.bf16.mxu1 %v5034_v37  ;;  %4679 = vmatprep.mubr.bf16.mxu0 %v5050_v39  ;;  %v5086_v39 = vld [vmem:[#allocation8 + $0x38] sm:$0xff]  }
  0xb5   : > { %4228 = vmatpush3.bf16.msra.mxu0 %v5074_v42  ;;  %4756 = vmatpush3.bf16.msra.mxu1 %v5080_v62  ;;  %v5087_v42 = vld [vmem:[#allocation8 + $0x70] sm:$0xff]   ;;  %v5092_v62 = vld [vmem:[#allocation8 + $0x60] sm:$0xff]  }
  0xb6   : > { %4229 = vmatprep.subr.bf16.mxu0 %v5076_v60  ;;  %4757 = vmatprep.subr.bf16.mxu1 %v5082_v63  ;;  %v5103_v60 = vld [vmem:[#allocation8 + $0x90] sm:$0xff]  }
  0xb9   : > { %4230 = vmatpush3.bf16.msra.mxu0 %v5078_v61  ;;  %4758 = vmatpush3.bf16.msra.mxu1 %v5082_v63 }
  0xba   : > { %4791 = vmatprep.subr.bf16.mxu0 %v5081_v0  ;;  %4351 = vmatprep.subr.bf16.mxu1 %v5085_v1 }
  0xbb   : > { %4728 = vmatmul.mubr.bf16.gmra.mxu1 %v5035_v43  ;;  %4680 = vmatmul.mubr.bf16.gmra.mxu0 %v5051_v44 }
  0xbc   : > { %4731 = vmatprep.mubr.bf16.mxu1 %v5036_v45  ;;  %4683 = vmatprep.mubr.bf16.mxu0 %v5055_v46 }
  0xc3   : > { %4732 = vmatmul.mubr.bf16.gmra.mxu1 %v5037_v47  ;;  %4684 = vmatmul.mubr.bf16.gmra.mxu0 %v5057_v48 }
  0xc4   : > { %4735 = vmatprep.mubr.bf16.mxu1 %v5038_v49  ;;  %4687 = vmatprep.mubr.bf16.mxu0 %v5060_v50  ;;  %v5088_v49 = vld [vmem:[#allocation8 + $0x30] sm:$0xff]   ;;  %v5099_v50 = vld [vmem:[#allocation8 + $0x98] sm:$0xff]  }
  0xcb   : > { %4736 = vmatmul.mubr.bf16.gmra.mxu1 %v5039_v51  ;;  %4688 = vmatmul.mubr.bf16.gmra.mxu0 %v5061_v52  ;;  %v5089_v52 = vld [vmem:[#allocation8 + $0x68] sm:$0xff]  }
  0xcc   : > { %4739 = vmatprep.mubr.bf16.mxu1 %v5040_v53  ;;  %4691 = vmatprep.mubr.bf16.mxu0 %v5064_v54 }
  0xd3   : > { %4740 = vmatmul.mubr.bf16.gmra.mxu1 %v5041_v55  ;;  %4692 = vmatmul.mubr.bf16.gmra.mxu0 %v5065_v56 }
 0x15b   : > { %v4713_v3 = vpop.f32.mrf.mxu1 }
 0x15c   : > { %v1421_v5 = vadd.f32 %v4713_v3, %v5629_v2 }
 0x15d   : > { %v1412_v4 = vpop.f32.mrf.mxu1 }
 0x15e   : > { %v1413_v7 = vadd.f32 %v5629_v2, %v1412_v4  ;;  %v1541_v10 = vmax.f32 %v1421_v5, 0.0 }
 0x15f   : > { %v4714_v6 = vpop.f32.mrf.mxu1 }
 0x160   : > { %v1424_v8 = vadd.f32 %v4714_v6, %v5629_v2  ;;  %v1539_v14 = vmax.f32 %v1413_v7, 0.0  ;;  %v5093_v6 = vld [vmem:[#allocation8 + $0x20] sm:$0xff]   ;;  %v5104_v7 = vld [vmem:[#allocation8 + $0x88] sm:$0xff]  }
 0x161   : > { %v1415_v9 = vpop.f32.mrf.mxu1 }
 0x162   : > { %v1542_v11 = vmax.f32 %v1424_v8, 0.0  ;;  %v1416_v12 = vadd.f32 %v5629_v2, %v1415_v9  ;;  %v5094_v9 = vld [vmem:[#allocation8 + $0x58] sm:$0xff]  }
 0x163   : > { %v4717_v13 = vpop.f32.mrf.mxu1 }
 0x164   : > { %v5635_v15 = vpack.c.bf16 %v1542_v11, %v1541_v10  ;;  %v1540_v16 = vmax.f32 %v1416_v12, 0.0  ;;  %v1437_v17 = vadd.f32 %v4717_v13, %v5629_v2 }
 0x165   : > { %v1428_v18 = vpop.f32.mrf.mxu1 }
 0x166   : > { %v1429_v19 = vadd.f32 %v5629_v2, %v1428_v18  ;;  %4759 = vmatprep.mubr.bf16.mxu1 %v5635_v15  ;;  %v1571_v20 = vpack.c.bf16 %v1540_v16, %v1539_v14  ;;  %v1545_v24 = vmax.f32 %v1437_v17, 0.0  ;;  %v5095_v16 = vld [vmem:[#allocation8 + $0x18] sm:$0xff]   ;;  %v5105_v17 = vld [vmem:[#allocation8 + $0x80] sm:$0xff]  }
 0x167   : > { %v4718_v21 = vpop.f32.mrf.mxu1 }
 0x168   : > { %v1440_v23 = vadd.f32 %v4718_v21, %v5629_v2  ;;  %1812 = vmatprep.mubr.bf16.mxu0 %v1571_v20  ;;  %v1543_v27 = vmax.f32 %v1429_v19, 0.0  ;;  %v5096_v19 = vld [vmem:[#allocation8 + $0x50] sm:$0xff]  }
 0x169   : > { %v1431_v25 = vpop.f32.mrf.mxu1  ;;  %1813 = vmatmul.mubr.bf16.vlgmr.msra.gmra.mxu0 %v6730_v26 }
 0x16a   : > { %v1546_v28 = vmax.f32 %v1440_v23, 0.0  ;;  %v1432_v29 = vadd.f32 %v5629_v2, %v1431_v25  ;;  %4792 = vmatpush3.bf16.msra.mxu0 %v5081_v0  ;;  %1820 = vmatprep.mubr.bf16.mxu0 %v5635_v15 }
 0x16b   : > { %v4721_v30 = vpop.f32.mrf.mxu1  ;;  %4793 = vmatprep.subr.bf16.mxu0 %v5083_v22 }
 0x16c   : > { %v1544_v32 = vmax.f32 %v1432_v29, 0.0  ;;  %v5644_v33 = vpack.c.bf16 %v1546_v28, %v1545_v24  ;;  %v1453_v34 = vadd.f32 %v4721_v30, %v5629_v2  ;;  %v5098_v29 = vld [vmem:[#allocation8 + $0x48] sm:$0xff]  }
 0x16d   : > { %v1444_v35 = vpop.f32.mrf.mxu1 }
 0x16e   : > { %v5647_v36 = vpack.c.bf16 %v1544_v32, %v1543_v27  ;;  %v1445_v37 = vadd.f32 %v5629_v2, %v1444_v35  ;;  %4794 = vmatpush3.bf16.msra.mxu0 %v5083_v22  ;;  %v1549_v43 = vmax.f32 %v1453_v34, 0.0  ;;  %v5097_v27 = vld [vmem:[#allocation8 + $0x10] sm:$0xff]  }
 0x16f   : > { %v4722_v38 = vpop.f32.mrf.mxu1  ;;  %4795 = vmatprep.subr.bf16.mxu0 %v5084_v31 }
 0x170   : > { %v1456_v41 = vadd.f32 %v4722_v38, %v5629_v2  ;;  %4760 = vmatmul.mubr.bf16.vlgmr.msra.gmra.mxu1 %v5647_v36  ;;  %v1547_v45 = vmax.f32 %v1445_v37, 0.0  ;;  %v5100_v37 = vld [vmem:[#allocation8 + $0x8] sm:$0xff]   ;;  %v5685_v38 = vld [vmem:[#allocation7 + $0x38] sm:$0xff]  }
 0x171   : > { %v1447_v44 = vpop.f32.mrf.mxu1  ;;  %1821 = vmatmul.mubr.bf16.gmra.mxu0 %v1571_v20  ;;  %4763 = vmatprep.mubr.bf16.mxu1 %v5644_v33 }
 0x172   : > { %v1550_v46 = vmax.f32 %v1456_v41, 0.0  ;;  %v1448_v47 = vadd.f32 %v5629_v2, %v1447_v44  ;;  %1828 = vmatprep.mubr.bf16.mxu0 %v5647_v36  ;;  %4796 = vmatpush3.bf16.msra.mxu0 %v5084_v31 }
 0x173   : > { %v4725_v48 = vpop.f32.mrf.mxu1  ;;  %4352 = vmatpush3.bf16.msra.mxu1 %v5086_v39  ;;  %4797 = vmatprep.subr.bf16.mxu0 %v5090_v40 }
 0x174   : > { %v1548_v51 = vmax.f32 %v1448_v47, 0.0  ;;  %4353 = vmatprep.subr.bf16.mxu1 %v5087_v42  ;;  %v5655_v53 = vpack.c.bf16 %v1550_v46, %v1549_v43  ;;  %v1469_v54 = vadd.f32 %v4725_v48, %v5629_v2  ;;  %v5102_v47 = vld [vmem:[#allocation8] sm:$0xff]  }
 0x175   : > { %v1460_v55 = vpop.f32.mrf.mxu1 }
 0x176   : > { %v1461_v56 = vadd.f32 %v5629_v2, %v1460_v55  ;;  %v5659_v57 = vpack.c.bf16 %v1548_v51, %v1547_v45  ;;  %4798 = vmatpush3.bf16.msra.mxu0 %v5090_v40  ;;  %v1553_v63 = vmax.f32 %v1469_v54, 0.0  ;;  %v5101_v40 = vld [vmem:[#allocation8 + $0x40] sm:$0xff]   ;;  %v4665_v54 = vpop.f32.mrf.mxu0 }
 0x177   : > { %v4726_v58 = vpop.f32.mrf.mxu1  ;;  %4354 = vmatpush3.bf16.msra.mxu1 %v5088_v49  ;;  %4799 = vmatprep.subr.bf16.mxu0 %v5099_v50 }
 0x178   : > { %v1472_v61 = vadd.f32 %v4726_v58, %v5629_v2  ;;  %4764 = vmatmul.mubr.bf16.gmra.mxu1 %v5659_v57  ;;  %4355 = vmatprep.subr.bf16.mxu1 %v5089_v52  ;;  %v1551_v1 = vmax.f32 %v1461_v56, 0.0 }
 0x179   : > { %v1463_v0 = vpop.f32.mrf.mxu1  ;;  %1829 = vmatmul.mubr.bf16.gmra.mxu0 %v5635_v15  ;;  %4767 = vmatprep.mubr.bf16.mxu1 %v5655_v53 }
 0x17a   : > { %v1554_v3 = vmax.f32 %v1472_v61, 0.0  ;;  %v1464_v4 = vadd.f32 %v5629_v2, %v1463_v0  ;;  %1836 = vmatprep.mubr.bf16.mxu0 %v5644_v33  ;;  %4800 = vmatpush3.bf16.msra.mxu0 %v5099_v50 }
 0x17b   : > { %v4729_v5 = vpop.f32.mrf.mxu1  ;;  %4356 = vmatpush3.bf16.msra.mxu1 %v5091_v59  ;;  %4801 = vmatprep.subr.bf16.mxu0 %v5103_v60 }
 0x17c   : > { %v1552_v8 = vmax.f32 %v1464_v4, 0.0  ;;  %4357 = vmatprep.subr.bf16.mxu1 %v5092_v62  ;;  %v5667_v10 = vpack.c.bf16 %v1554_v3, %v1553_v63  ;;  %v1485_v11 = vadd.f32 %v4729_v5, %v5629_v2  ;;  %v963_v63 = vpop.f32.mrf.mxu0 }
 0x17d   : > { %v1476_v12 = vpop.f32.mrf.mxu1 }
 0x17e   : > { %v1477_v13 = vadd.f32 %v5629_v2, %v1476_v12  ;;  %v5671_v14 = vpack.c.bf16 %v1552_v8, %v1551_v1  ;;  %4802 = vmatpush3.bf16.msra.mxu0 %v5103_v60  ;;  %v1557_v20 = vmax.f32 %v1485_v11, 0.0 }
 0x17f   : > { %v4730_v15 = vpop.f32.mrf.mxu1  ;;  %4358 = vmatpush3.bf16.msra.mxu1 %v5093_v6  ;;  %4803 = vmatprep.subr.bf16.mxu0 %v5104_v7 }
 0x180   : > { %v1488_v18 = vadd.f32 %v4730_v15, %v5629_v2  ;;  %4768 = vmatmul.mubr.bf16.gmra.mxu1 %v5671_v14  ;;  %4359 = vmatprep.subr.bf16.mxu1 %v5094_v9  ;;  %v1555_v22 = vmax.f32 %v1477_v13, 0.0  ;;  %v313_v9 = vlaneseq }
 0x181   : > { %v1479_v21 = vpop.f32.mrf.mxu1  ;;  %1837 = vmatmul.mubr.bf16.gmra.mxu0 %v5647_v36  ;;  %4771 = vmatprep.mubr.bf16.mxu1 %v5667_v10 }
 0x182   : > { %v1558_v23 = vmax.f32 %v1488_v18, 0.0  ;;  %v1480_v24 = vadd.f32 %v5629_v2, %v1479_v21  ;;  %1844 = vmatprep.mubr.bf16.mxu0 %v5659_v57  ;;  %4804 = vmatpush3.bf16.msra.mxu0 %v5104_v7 }
 0x183   : > { %v4733_v25 = vpop.f32.mrf.mxu1  ;;  %4360 = vmatpush3.bf16.msra.mxu1 %v5095_v16  ;;  %4805 = vmatprep.subr.bf16.mxu0 %v5105_v17 }
 0x184   : > { %v1556_v28 = vmax.f32 %v1480_v24, 0.0  ;;  %4361 = vmatprep.subr.bf16.mxu1 %v5096_v19  ;;  %v5679_v30 = vpack.c.bf16 %v1558_v23, %v1557_v20  ;;  %v1501_v31 = vadd.f32 %v4733_v25, %v5629_v2  ;;  %v5718_v19 = vshrl.u32 %v313_v9, 7 }
 0x185   : > { %v1492_v32 = vpop.f32.mrf.mxu1 }
 0x186   : > { %v1493_v34 = vadd.f32 %v5629_v2, %v1492_v32  ;;  %v5683_v35 = vpack.c.bf16 %v1556_v28, %v1555_v22  ;;  %4806 = vmatpush3.bf16.msra.mxu0 %v5105_v17  ;;  %v1561_v41 = vmax.f32 %v1501_v31, 0.0  ;;  %v964_v22 = vadd.f32 %v5629_v2, %v963_v63 }
 0x187   : > { %v4734_v36 = vpop.f32.mrf.mxu1  ;;  %4362 = vmatpush3.bf16.msra.mxu1 %v5097_v27  ;;  %4839 = vmatprep.subr.bf16.mxu0 %v5685_v38  ;;  %v350_v25 = vand.u32 15, %v5718_v19  ;;  %v316_v31 = vadd.s32 16, %v5718_v19  ;;  %v972_v32 = vadd.f32 %v4665_v54, %v5629_v2  ;;  %v320_v54 = vadd.s32 48, %v5718_v19 }
 0x188   : > { %v1504_v39 = vadd.f32 %v4734_v36, %v5629_v2  ;;  %4772 = vmatmul.mubr.bf16.gmra.mxu1 %v5683_v35  ;;  %4363 = vmatprep.subr.bf16.mxu1 %v5098_v29  ;;  %v1559_v43 = vmax.f32 %v1493_v34, 0.0  ;;  %v1090_v27 = vmax.f32 %v964_v22, 0.0 }
 0x189   : > { %v1495_v42 = vpop.f32.mrf.mxu1  ;;  %1845 = vmatmul.mubr.bf16.gmra.mxu0 %v5644_v33  ;;  %4775 = vmatprep.mubr.bf16.mxu1 %v5679_v30  ;;  %vm1122_vm0 = vcmp.ge.s32.totalorder %v350_v25, 1 }
 0x18a   : > { %v1562_v44 = vmax.f32 %v1504_v39, 0.0  ;;  %v1496_v45 = vadd.f32 %v5629_v2, %v1495_v42  ;;  %1852 = vmatprep.mubr.bf16.mxu0 %v5655_v53  ;;  %vm5735_vm2 = vmpackc.low %vm5350_vm1, %vm1122_vm0  ;;  %v364_v39 = vand.u32 15, %v316_v31 }
 0x18b   : > { %v4737_v46 = vpop.f32.mrf.mxu1  ;;  %4364 = vmatpush3.bf16.msra.mxu1 %v5100_v37  ;;  %v328_v37 = vadd.s32 112, %v5718_v19 }
 0x18c   : > { %v1560_v48 = vmax.f32 %v1496_v45, 0.0  ;;  %4365 = vmatprep.subr.bf16.mxu1 %v5101_v40  ;;  %v5694_v49 = vpack.c.bf16 %v1562_v44, %v1561_v41  ;;  %v1517_v50 = vadd.f32 %v4737_v46, %v5629_v2  ;;  %v1092_v40 = vmax.f32 %v972_v32, 0.0 }
 0x18d   : > { %v1508_v51 = vpop.f32.mrf.mxu1  ;;  %vm1124_vm3 = vcmp.ge.s32.totalorder %v364_v39, 1 }
 0x18e   : > { %v1509_v33 = vadd.f32 %v5629_v2, %v1508_v51  ;;  %v5698_v52 = vpack.c.bf16 %v1560_v48, %v1559_v43  ;;  %v1565_v58 = vmax.f32 %v1517_v50, 0.0  ;;  %v318_v43 = vadd.s32 32, %v5718_v19  ;;  %vm5750_vm4 = vmpackc.low %vm5350_vm1, %vm1124_vm3 }
 0x18f   : > { %v4738_v55 = vpop.f32.mrf.mxu1  ;;  %4366 = vmatpush3.bf16.msra.mxu1 %v5102_v47 }
 0x190   : > { %v1520_v56 = vadd.f32 %v4738_v55, %v5629_v2  ;;  %4776 = vmatmul.mubr.bf16.gmra.mxu1 %v5698_v52  ;;  %v1563_v60 = vmax.f32 %v1509_v33, 0.0  ;;  %v378_v48 = vand.u32 15, %v318_v43 }
 0x191   : > { %v1511_v59 = vpop.f32.mrf.mxu1  ;;  %1853 = vmatmul.mubr.bf16.gmra.mxu0 %v5659_v57  ;;  %4779 = vmatprep.mubr.bf16.mxu1 %v5694_v49  ;;  %v4666_v57 = vpop.f32.mrf.mxu0 }
 0x192   : > { %v1566_v61 = vmax.f32 %v1520_v56, 0.0  ;;  %v1512_v62 = vadd.f32 %v5629_v2, %v1511_v59  ;;  %1860 = vmatprep.mubr.bf16.mxu0 %v5671_v14  ;;  %v975_v34 = vadd.f32 %v4666_v57, %v5629_v2  ;;  %vm1126_vm5 = vcmp.ge.s32.totalorder %v378_v48, 1 }
 0x193   : > { %v4741_v0 = vpop.f32.mrf.mxu1  ;;  %v966_v18 = vpop.f32.mrf.mxu0  ;;  %vm5766_vm6 = vmpackc.low %vm5350_vm1, %vm1126_vm5 }
 0x194   : > { %v1564_v1 = vmax.f32 %v1512_v62, 0.0  ;;  %v5706_v3 = vpack.c.bf16 %v1566_v61, %v1565_v58  ;;  %v1533_v4 = vadd.f32 %v4741_v0, %v5629_v2  ;;  %v967_v23 = vadd.f32 %v5629_v2, %v966_v18 }
 0x195   : > { %v1524_v5 = vpop.f32.mrf.mxu1  ;;  %v1093_v41 = vmax.f32 %v975_v34, 0.0  ;;  %v322_v0 = vadd.s32 64, %v5718_v19 }
 0x196   : > { %v1525_v6 = vadd.f32 %v5629_v2, %v1524_v5  ;;  %v5710_v7 = vpack.c.bf16 %v1564_v1, %v1563_v60  ;;  %v1569_v12 = vmax.f32 %v1533_v4, 0.0  ;;  %v1091_v28 = vmax.f32 %v967_v23, 0.0 }
 0x197   : > { %v4742_v8 = vpop.f32.mrf.mxu1  ;;  %v5745_v44 = vpack.c.bf16 %v1093_v41, %v1092_v40  ;;  %v392_v60 = vand.u32 15, %v320_v54  ;;  %v406_v57 = vand.u32 15, %v322_v0 }
 0x198   : > { %v1536_v11 = vadd.f32 %v4742_v8, %v5629_v2  ;;  %4780 = vmatmul.mubr.bf16.gmra.mxu1 %v5710_v7  ;;  %v1567_v15 = vmax.f32 %v1525_v6, 0.0  ;;  %v3845_v36 = vpack.c.bf16 %v1091_v28, %v1090_v27 }
 0x199   : > { %v1527_v13 = vpop.f32.mrf.mxu1  ;;  %1861 = vmatmul.mubr.bf16.gmra.mxu0 %v5655_v53  ;;  %4783 = vmatprep.mubr.bf16.mxu1 %v5706_v3  ;;  %v4669_v53 = vpop.f32.mrf.mxu0  ;;  %vm1128_vm7 = vcmp.ge.s32.totalorder %v392_v60, 1  ;;  %vm1130_vm9 = vcmp.ge.s32.totalorder %v406_v57, 1 }
 0x19a   : > { %v1570_v16 = vmax.f32 %v1536_v11, 0.0  ;;  %v1528_v17 = vadd.f32 %v5629_v2, %v1527_v13  ;;  %1868 = vmatprep.mubr.bf16.mxu0 %v5667_v10  ;;  %v988_v55 = vadd.f32 %v4669_v53, %v5629_v2  ;;  %vm5783_vm8 = vmpackc.low %vm5350_vm1, %vm1128_vm7  ;;  %v326_v53 = vadd.s32 96, %v5718_v19 }
 0x19b   : > { %v979_v29 = vpop.f32.mrf.mxu0  ;;  %vm5801_vm10 = vmpackc.low %vm5350_vm1, %vm1130_vm9 }
 0x19c   : > { %v1568_v20 = vmax.f32 %v1528_v17, 0.0  ;;  %v5720_v21 = vpack.c.bf16 %v1570_v16, %v1569_v12  ;;  %v980_v45 = vadd.f32 %v5629_v2, %v979_v29  ;;  %v1096_v61 = vmax.f32 %v988_v55, 0.0  ;;  %v5119_v29 = vld [vmem:[#allocation8 + $0x1b8] sm:$0xff]  }
 0x19d   : > { %v324_v12 = vadd.s32 80, %v5718_v19  ;;  %v434_v31 = vand.u32 15, %v326_v53  ;;  %v5118_v53 = vld [vmem:[#allocation8 + $0x1f8] sm:$0xff]  }
 0x19e   : > { %v5724_v24 = vpack.c.bf16 %v1568_v20, %v1567_v15  ;;  %v1094_v50 = vmax.f32 %v980_v45, 0.0  ;;  %4511 = vmatprep.subr.bf16.mxu1 %v5118_v53 }
 0x19f   : > { %v420_v18 = vand.u32 15, %v324_v12  ;;  %vm1134_vm13 = vcmp.ge.s32.totalorder %v434_v31, 1  ;;  %v5151_v31 = vld [vmem:[#allocation7 + $0x10] sm:$0xff]  }
 0x1a0   : > { %4784 = vmatmul.mubr.bf16.gmra.mxu1 %v5724_v24  ;;  %vm5837_vm14 = vmpackc.low %vm5350_vm1, %vm1134_vm13 }
 0x1a1   : > { %1869 = vmatmul.mubr.bf16.gmra.mxu0 %v5671_v14  ;;  %4787 = vmatprep.mubr.bf16.mxu1 %v5720_v21  ;;  %v4670_v14 = vpop.f32.mrf.mxu0  ;;  %vm1132_vm11 = vcmp.ge.s32.totalorder %v420_v18, 1  ;;  %v5109_v18 = vld [vmem:[%s5570_s28 + $0x118] sm:$0xff]  }
 0x1a2   : > { %1876 = vmatprep.mubr.bf16.mxu0 %v5683_v35  ;;  %v991_v56 = vadd.f32 %v4670_v14, %v5629_v2  ;;  %vm5819_vm12 = vmpackc.low %vm5350_vm1, %vm1132_vm11 }
 0x1a3   : > { %v982_v42 = vpop.f32.mrf.mxu0 }
 0x1a4   : > { %v983_v46 = vadd.f32 %v5629_v2, %v982_v42  ;;  %v1097_v62 = vmax.f32 %v991_v56, 0.0  ;;  %v448_v42 = vand.u32 15, %v328_v37 }
 0x1a6   : > { %v1095_v51 = vmax.f32 %v983_v46, 0.0  ;;  %v5778_v1 = vpack.c.bf16 %v1097_v62, %v1096_v61  ;;  %vm1136_vm15 = vcmp.ge.s32.totalorder %v448_v42, 1  ;;  %v340_v42 = vadd.s32 208, %v5718_v19 }
 0x1a7   : > { %vm5855_vm0 = vmpackc.low %vm5350_vm1, %vm1136_vm15 }
 0x1a8   : > { %4788 = vmatmul.mubr.bf16.gmra.mxu1 %v6730_v26  ;;  %v5763_v58 = vpack.c.bf16 %v1095_v51, %v1094_v50 }
 0x1a9   : > { %1877 = vmatmul.mubr.bf16.gmra.mxu0 %v5667_v10  ;;  %3846 = vmatprep.mubr.msk.bf16.mxu1 %vm5735_vm2, %v3845_v36  ;;  %v4673_v10 = vpop.f32.mrf.mxu0 }
 0x1aa   : > { %1884 = vmatprep.mubr.bf16.mxu0 %v5679_v30  ;;  %v1004_v13 = vadd.f32 %v4673_v10, %v5629_v2  ;;  %v330_v10 = vadd.s32 128, %v5718_v19 }
 0x1ab   : > { %v995_v33 = vpop.f32.mrf.mxu0 }
 0x1ac   : > { %v996_v4 = vadd.f32 %v5629_v2, %v995_v33  ;;  %v1100_v20 = vmax.f32 %v1004_v13, 0.0  ;;  %v462_v54 = vand.u32 15, %v330_v10  ;;  %v5149_v13 = vld [vmem:[#allocation7 + $0x20] sm:$0xff]   ;;  %v5122_v33 = vld [vmem:[#allocation8 + $0x1f0] sm:$0xff]  }
 0x1ad   : > { %v4674_v59 = vpop.f32.mrf.mxu0 }
 0x1ae   : > { %v1098_v8 = vmax.f32 %v996_v4, 0.0  ;;  %v1007_v15 = vadd.f32 %v4674_v59, %v5629_v2  ;;  %v332_v59 = vadd.s32 144, %v5718_v19 }
 0x1af   : > { %v998_v63 = vpop.f32.mrf.mxu0 }
 0x1b0   : > { %2279 = vmatmul.mubr.bf16.vlgmr.msra.gmra.mxu1 %v6730_v26  ;;  %v999_v5 = vadd.f32 %v5629_v2, %v998_v63  ;;  %v1101_v22 = vmax.f32 %v1007_v15, 0.0  ;;  %v476_v0 = vand.u32 15, %v332_v59  ;;  %v336_v15 = vadd.s32 176, %v5718_v19 }
 0x1b1   : > { %1885 = vmatmul.mubr.bf16.gmra.mxu0 %v5683_v35  ;;  %3849 = vmatprep.mubr.msk.bf16.mxu1 %vm5750_vm4, %v5745_v44 }
 0x1b2   : > { %1892 = vmatprep.mubr.bf16.mxu0 %v5698_v52  ;;  %v1099_v9 = vmax.f32 %v999_v5, 0.0  ;;  %v5814_v25 = vpack.c.bf16 %v1101_v22, %v1100_v20  ;;  %v5147_v5 = vld [vmem:[#allocation7 + $0x30] sm:$0xff]   ;;  %v504_v22 = vand.u32 15, %v336_v15  ;;  %4512 = vmatpush3.bf16.msra.mxu1 %v5119_v29  ;;  %v5129_v15 = vld [vmem:[#allocation8 + $0x1a0] sm:$0xff]  }
 0x1b3   : > { %4513 = vmatprep.subr.bf16.mxu1 %v5122_v33  ;;  %v5113_v33 = vld [vmem:[%s5570_s28 + $0x138] sm:$0xff]  }
 0x1b4   : > { %v5798_v16 = vpack.c.bf16 %v1099_v9, %v1098_v8  ;;  %v5126_v8 = vld [vmem:[#allocation8 + $0x1e8] sm:$0xff]  }
 0x1b8   : > { %3852 = vmatmul.mubr.msk.bf16.gmra.mxu1 %vm5735_vm2, %v3845_v36  ;;  %vm1138_vm2 = vcmp.ge.s32.totalorder %v462_v54, 1  ;;  %v5123_v54 = vld [vmem:[#allocation8 + $0x1b0] sm:$0xff]  }
 0x1b9   : > { %1893 = vmatmul.mubr.bf16.gmra.mxu0 %v5679_v30  ;;  %3855 = vmatprep.mubr.msk.bf16.mxu1 %vm5766_vm6, %v5763_v58  ;;  %v4677_v30 = vpop.f32.mrf.mxu0  ;;  %vm5875_vm3 = vmpackc.low %vm5350_vm1, %vm1138_vm2 }
 0x1ba   : > { %1900 = vmatprep.mubr.bf16.mxu0 %v5694_v49  ;;  %v1020_v14 = vadd.f32 %v4677_v30, %v5629_v2  ;;  %v334_v30 = vadd.s32 160, %v5718_v19  ;;  %4514 = vmatpush3.bf16.msra.mxu1 %v5123_v54 }
 0x1bb   : > { %v1011_v11 = vpop.f32.mrf.mxu0  ;;  %4515 = vmatprep.subr.bf16.mxu1 %v5126_v8 }
 0x1bc   : > { %v1012_v27 = vadd.f32 %v5629_v2, %v1011_v11  ;;  %v1104_v43 = vmax.f32 %v1020_v14, 0.0  ;;  %v490_v6 = vand.u32 15, %v334_v30 }
 0x1bd   : > { %v4678_v17 = vpop.f32.mrf.mxu0 }
 0x1be   : > { %v1102_v32 = vmax.f32 %v1012_v27, 0.0  ;;  %v1023_v39 = vadd.f32 %v4678_v17, %v5629_v2 }
 0x1bf   : > { %v1014_v23 = vpop.f32.mrf.mxu0 }
 0x1c0   : > { %3858 = vmatmul.mubr.msk.bf16.gmra.mxu1 %vm5750_vm4, %v5745_v44  ;;  %v1015_v28 = vadd.f32 %v5629_v2, %v1014_v23  ;;  %v1105_v45 = vmax.f32 %v1023_v39, 0.0  ;;  %v5150_v23 = vld [vmem:[#allocation7 + $0x18] sm:$0xff]   ;;  %v5152_v39 = vld [vmem:[#allocation7 + $0x8] sm:$0xff]  }
 0x1c1   : > { %1901 = vmatmul.mubr.bf16.gmra.mxu0 %v5698_v52  ;;  %3861 = vmatprep.mubr.msk.bf16.mxu1 %vm5783_vm8, %v5778_v1 }
 0x1c2   : > { %1908 = vmatprep.mubr.bf16.mxu0 %v5710_v7  ;;  %v1103_v34 = vmax.f32 %v1015_v28, 0.0  ;;  %v5850_v48 = vpack.c.bf16 %v1105_v45, %v1104_v43  ;;  %v5153_v43 = vld [vmem:[#allocation7] sm:$0xff]  }
 0x1c4   : > { %v5834_v40 = vpack.c.bf16 %v1103_v34, %v1102_v32 }
 0x1c8   : > { %3864 = vmatmul.mubr.msk.bf16.gmra.mxu1 %vm5766_vm6, %v5763_v58 }
 0x1c9   : > { %1909 = vmatmul.mubr.bf16.gmra.mxu0 %v5694_v49  ;;  %3867 = vmatprep.mubr.msk.bf16.mxu1 %vm5801_vm10, %v5798_v16  ;;  %v4681_v49 = vpop.f32.mrf.mxu0 }
 0x1ca   : > { %1916 = vmatprep.mubr.bf16.mxu0 %v5706_v3  ;;  %v1036_v60 = vadd.f32 %v4681_v49, %v5629_v2  ;;  %v338_v49 = vadd.s32 192, %v5718_v19 }
 0x1cb   : > { %v1027_v36 = vpop.f32.mrf.mxu0 }
 0x1cc   : > { %v1028_v50 = vadd.f32 %v5629_v2, %v1027_v36  ;;  %v518_v14 = vand.u32 15, %v338_v49 }
 0x1cd   : > { %v4682_v41 = vpop.f32.mrf.mxu0 }
 0x1ce   : > { %v1039_v61 = vadd.f32 %v4682_v41, %v5629_v2 }
 0x1cf   : > { %v1030_v46 = vpop.f32.mrf.mxu0 }
 0x1d0   : > { %3870 = vmatmul.mubr.msk.bf16.gmra.mxu1 %vm5783_vm8, %v5778_v1  ;;  %v1031_v51 = vadd.f32 %v5629_v2, %v1030_v46  ;;  %v1109_v47 = vmax.f32 %v1039_v61, 0.0 }
 0x1d1   : > { %1917 = vmatmul.mubr.bf16.gmra.mxu0 %v5710_v7  ;;  %3873 = vmatprep.mubr.msk.bf16.mxu1 %vm5819_vm12, %v5814_v25 }
 0x1d2   : > { %1924 = vmatprep.mubr.bf16.mxu0 %v5724_v24  ;;  %v1107_v55 = vmax.f32 %v1031_v51, 0.0  ;;  %v532_v51 = vand.u32 15, %v340_v42  ;;  %v5131_v42 = vld [vmem:[#allocation8 + $0x198] sm:$0xff]  }
 0x1d8   : > { %3876 = vmatmul.mubr.msk.bf16.gmra.mxu1 %vm5801_vm10, %v5798_v16 }
 0x1d9   : > { %1925 = vmatmul.mubr.bf16.gmra.mxu0 %v5706_v3  ;;  %3879 = vmatprep.mubr.msk.bf16.mxu1 %vm5837_vm14, %v5834_v40  ;;  %v4685_v3 = vpop.f32.mrf.mxu0 }
 0x1da   : > { %1932 = vmatprep.mubr.bf16.mxu0 %v5720_v21  ;;  %v1106_v21 = vmax.f32 %v1028_v50, 0.0  ;;  %v1052_v17 = vadd.f32 %v4685_v3, %v5629_v2 }
 0x1db   : > { %v1043_v56 = vpop.f32.mrf.mxu0 }
 0x1dc   : > { %v5872_v62 = vpack.c.bf16 %v1107_v55, %v1106_v21  ;;  %v1044_v35 = vadd.f32 %v5629_v2, %v1043_v56  ;;  %v342_v56 = vadd.s32 224, %v5718_v19 }
 0x1dd   : > { %v4686_v63 = vpop.f32.mrf.mxu0 }
 0x1de   : > { %v1110_v9 = vmax.f32 %v1044_v35, 0.0 }
 0x1df   : > { %v1046_v4 = vpop.f32.mrf.mxu0 }
 0x1e0   : > { %3882 = vmatmul.mubr.msk.bf16.gmra.mxu1 %vm5819_vm12, %v5814_v25 }
 0x1e1   : > { %1933 = vmatmul.mubr.bf16.gmra.mxu0 %v5724_v24  ;;  %3885 = vmatprep.mubr.msk.bf16.mxu1 %vm5855_vm0, %v5850_v48 }
 0x1e2   : > { %4807 = vmatprep.mubr.msk.bf16.mxu0 %vm5750_vm4, %v5745_v44  ;;  %v1108_v44 = vmax.f32 %v1036_v60, 0.0  ;;  %vm1140_vm4 = vcmp.ge.s32.totalorder %v476_v0, 1  ;;  %v344_v60 = vadd.s32 240, %v5718_v19  ;;  %v546_v0 = vand.u32 15, %v342_v56 }
 0x1e3   : > { %vm5896_vm5 = vmpackc.low %vm5350_vm1, %vm1140_vm4 }
 0x1e4   : > { %v3896_v57 = vpack.c.bf16 %v1109_v47, %v1108_v44 }
 0x1e8   : > { %3888 = vmatmul.mubr.msk.bf16.gmra.mxu1 %vm5837_vm14, %v5834_v40 }
 0x1e9   : > { %4808 = vmatmul.mubr.msk.bf16.vlgmr.msra.gmra.mxu0 %vm5766_vm6, %v5763_v58  ;;  %3891 = vmatprep.mubr.msk.bf16.mxu1 %vm5875_vm3, %v5872_v62  ;;  %v1047_v58 = vadd.f32 %v5629_v2, %v1046_v4  ;;  %vm1142_vm6 = vcmp.ge.s32.totalorder %v490_v6, 1  ;;  %v560_v4 = vand.u32 15, %v344_v60  ;;  %v5106_v6 = vld [vmem:[%s5570_s28 + $0x100] sm:$0xff]  }
 0x1ea   : > { %4840 = vmatpush3.bf16.msra.mxu0 %v5685_v38  ;;  %4811 = vmatprep.mubr.msk.bf16.mxu0 %vm5783_vm8, %v5778_v1  ;;  %v5900_v38 = vpop.f32.mrf.mxu0  ;;  %v5148_v1 = vld [vmem:[#allocation7 + $0x28] sm:$0xff]   ;;  %vm5917_vm7 = vmpackc.low %vm5350_vm1, %vm1142_vm6  ;;  %vm1144_vm8 = vcmp.ge.s32.totalorder %v504_v22, 1 }
 0x1eb   : > { %4841 = vmatprep.subr.bf16.mxu0 %v5147_v5  ;;  %v1111_v11 = vmax.f32 %v1047_v58, 0.0  ;;  %vm5936_vm9 = vmpackc.low %vm5350_vm1, %vm1144_vm8  ;;  %vm1152_vm15 = vcmp.ge.s32.totalorder %v560_v4, 1 }
 0x1ec   : > { %v1059_v12 = vpop.f32.mrf.mxu0  ;;  %vm3931_vm2 = vmpackc.low %vm5350_vm1, %vm1152_vm15 }
 0x1ed   : > { %v3902_v52 = vpack.c.bf16 %v1111_v11, %v1110_v9  ;;  %v1060_v34 = vadd.f32 %v5629_v2, %v1059_v12  ;;  %v5107_v9 = vld [vmem:[%s5570_s28 + $0x108] sm:$0xff]   ;;  %v5108_v11 = vld [vmem:[%s5570_s28 + $0x110] sm:$0xff]   ;;  %v5128_v12 = vld [vmem:[#allocation8 + $0x1e0] sm:$0xff]  }
 0x1ee   : > { %4842 = vmatpush3.bf16.msra.mxu0 %v5147_v5  ;;  %v4690_v20 = vpop.f32.mrf.mxu0 }
 0x1ef   : > { %4843 = vmatprep.subr.bf16.mxu0 %v5148_v1  ;;  %v1114_v7 = vmax.f32 %v1060_v34, 0.0  ;;  %v1071_v50 = vadd.f32 %v4690_v20, %v5629_v2  ;;  %v5110_v20 = vld [vmem:[%s5570_s28 + $0x120] sm:$0xff]   ;;  %v5111_v34 = vld [vmem:[%s5570_s28 + $0x128] sm:$0xff]  }
 0x1f0   : > { %3894 = vmatmul.mubr.msk.bf16.gmra.mxu1 %vm5855_vm0, %v5850_v48  ;;  %v1062_v28 = vpop.f32.mrf.mxu0 }
 0x1f1   : > { %4812 = vmatmul.mubr.msk.bf16.gmra.mxu0 %vm5801_vm10, %v5798_v16  ;;  %3897 = vmatprep.mubr.msk.bf16.mxu1 %vm5896_vm5, %v3896_v57  ;;  %v1055_v16 = vadd.f32 %v4686_v63, %v5629_v2  ;;  %v1063_v36 = vadd.f32 %v5629_v2, %v1062_v28  ;;  %vm1146_vm10 = vcmp.ge.s32.totalorder %v518_v14, 1  ;;  %v1117_v55 = vmax.f32 %v1071_v50, 0.0  ;;  %v5112_v14 = vld [vmem:[%s5570_s28 + $0x130] sm:$0xff]  }
 0x1f2   : > { %4815 = vmatprep.mubr.msk.bf16.mxu0 %vm5819_vm12, %v5814_v25  ;;  %4844 = vmatpush3.bf16.msra.mxu0 %v5148_v1  ;;  %v1112_v25 = vmax.f32 %v1052_v17, 0.0  ;;  %vm5951_vm11 = vmpackc.low %vm5350_vm1, %vm1146_vm10  ;;  %vm1148_vm12 = vcmp.ge.s32.totalorder %v532_v51, 1  ;;  %v5127_v1 = vld [vmem:[#allocation8 + $0x1a8] sm:$0xff]  }
 0x1f3   : > { %4845 = vmatprep.subr.bf16.mxu0 %v5149_v13  ;;  %v1113_v27 = vmax.f32 %v1055_v16, 0.0  ;;  %v1115_v41 = vmax.f32 %v1063_v36, 0.0  ;;  %vm5969_vm13 = vmpackc.low %vm5350_vm1, %vm1148_vm12  ;;  %4516 = vmatpush3.bf16.msra.mxu1 %v5127_v1 }
 0x1f4   : > { %4517 = vmatprep.subr.bf16.mxu1 %v5128_v12 }
 0x1f5   : > { %v3908_v32 = vpack.c.bf16 %v1113_v27, %v1112_v25  ;;  %v3914_v46 = vpack.c.bf16 %v1115_v41, %v1114_v7 }
 0x1f6   : > { %4846 = vmatpush3.bf16.msra.mxu0 %v5149_v13 }
 0x1f7   : > { %4847 = vmatprep.subr.bf16.mxu0 %v5150_v23  ;;  %4518 = vmatpush3.bf16.msra.mxu1 %v5129_v15 }
 0x1f8   : > { %3900 = vmatmul.mubr.msk.bf16.gmra.mxu1 %vm5875_vm3, %v5872_v62 }
 0x1f9   : > { %4816 = vmatmul.mubr.msk.bf16.gmra.mxu0 %vm5837_vm14, %v5834_v40  ;;  %3903 = vmatprep.mubr.msk.bf16.mxu1 %vm5917_vm7, %v3902_v52  ;;  %v4693_v40 = vpop.f32.mrf.mxu0  ;;  %vm1150_vm14 = vcmp.ge.s32.totalorder %v546_v0, 1 }
 0x1fa   : > { %4819 = vmatprep.mubr.msk.bf16.mxu0 %vm5855_vm0, %v5850_v48  ;;  %4848 = vmatpush3.bf16.msra.mxu0 %v5150_v23  ;;  %v1068_v48 = vadd.f32 %v5900_v38, %v5629_v2  ;;  %v1084_v44 = vadd.f32 %v4693_v40, %v5629_v2  ;;  %vm5986_vm0 = vmpackc.low %vm5350_vm1, %vm1150_vm14  ;;  %v5130_v40 = vld [vmem:[#allocation8 + $0x1d8] sm:$0xff]  }
 0x1fb   : > { %4849 = vmatprep.subr.bf16.mxu0 %v5151_v31  ;;  %v1075_v45 = vpop.f32.mrf.mxu0  ;;  %4519 = vmatprep.subr.bf16.mxu1 %v5130_v40 }
 0x1fc   : > { %v1116_v21 = vmax.f32 %v1068_v48, 0.0  ;;  %v1076_v24 = vadd.f32 %v5629_v2, %v1075_v45  ;;  %4520 = vmatpush3.bf16.msra.mxu1 %v5131_v42 }
 0x1fd   : > { %v4694_v3 = vpop.f32.mrf.mxu0 }
 0x1fe   : > { %4850 = vmatpush3.bf16.msra.mxu0 %v5151_v31  ;;  %v1087_v47 = vadd.f32 %v4694_v3, %v5629_v2  ;;  %v1118_v5 = vmax.f32 %v1076_v24, 0.0 }
 0x1ff   : > { %4851 = vmatprep.subr.bf16.mxu0 %v5152_v39  ;;  %v1078_v59 = vpop.f32.mrf.mxu0 }
 0x200   : > { %3906 = vmatmul.mubr.msk.bf16.gmra.mxu1 %vm5896_vm5, %v3896_v57  ;;  %v1079_v63 = vadd.f32 %v5629_v2, %v1078_v59  ;;  %v1121_v35 = vmax.f32 %v1087_v47, 0.0 }
 0x201   : > { %4820 = vmatmul.mubr.msk.bf16.gmra.mxu0 %vm5875_vm3, %v5872_v62  ;;  %3909 = vmatprep.mubr.msk.bf16.mxu1 %vm5936_vm9, %v3908_v32  ;;  %v3920_v62 = vpack.c.bf16 %v1117_v55, %v1116_v21  ;;  %v5114_v21 = vld [vmem:[%s5570_s28 + $0x140] sm:$0xff]  }
 0x202   : > { %4823 = vmatprep.mubr.msk.bf16.mxu0 %vm5896_vm5, %v3896_v57  ;;  %4852 = vmatpush3.bf16.msra.mxu0 %v5152_v39  ;;  %v1119_v30 = vmax.f32 %v1079_v63, 0.0  ;;  %v1120_v57 = vmax.f32 %v1084_v44, 0.0  ;;  %v5115_v44 = vld [vmem:[%s5570_s28 + $0x148] sm:$0xff]  }
 0x203   : > { %4853 = vmatprep.subr.bf16.mxu0 %v5153_v43 }
 0x204   : > { %v3926_v58 = vpack.c.bf16 %v1119_v30, %v1118_v5  ;;  %v3932_v38 = vpack.c.bf16 %v1121_v35, %v1120_v57  ;;  %v5116_v5 = vld [vmem:[%s5570_s28 + $0x150] sm:$0xff]  }
 0x205   : > { %v5132_v57 = vld [vmem:[#allocation8 + $0x1d0] sm:$0xff]  }
 0x206   : > { %4854 = vmatpush3.bf16.msra.mxu0 %v5153_v43  ;;  %4521 = vmatprep.subr.bf16.mxu1 %v5132_v57 }
 0x208   : > { %3912 = vmatmul.mubr.msk.bf16.gmra.mxu1 %vm5917_vm7, %v3902_v52 }
 0x209   : > { %4824 = vmatmul.mubr.msk.bf16.gmra.mxu0 %vm5917_vm7, %v3902_v52  ;;  %3915 = vmatprep.mubr.msk.bf16.mxu1 %vm5951_vm11, %v3914_v46 }
 0x20a   : > { %4827 = vmatprep.mubr.msk.bf16.mxu0 %vm5936_vm9, %v3908_v32 }
 0x210   : > { %3918 = vmatmul.mubr.msk.bf16.gmra.mxu1 %vm5936_vm9, %v3908_v32 }
 0x211   : > { %3921 = vmatprep.mubr.msk.bf16.mxu1 %vm5969_vm13, %v3920_v62  ;;  %4828 = vmatmul.mubr.msk.bf16.gmra.mxu0 %vm5951_vm11, %v3914_v46 }
 0x212   : > { %4831 = vmatprep.mubr.msk.bf16.mxu0 %vm5969_vm13, %v3920_v62 }
 0x218   : > { %3924 = vmatmul.mubr.msk.bf16.gmra.mxu1 %vm5951_vm11, %v3914_v46 }
 0x219   : > { %3927 = vmatprep.mubr.msk.bf16.mxu1 %vm5986_vm0, %v3926_v58  ;;  %4832 = vmatmul.mubr.msk.bf16.gmra.mxu0 %vm5986_vm0, %v3926_v58 }
 0x21a   : > { %4835 = vmatprep.mubr.msk.bf16.mxu0 %vm3931_vm2, %v3932_v38 }
 0x220   : > { %3930 = vmatmul.mubr.msk.bf16.gmra.mxu1 %vm5969_vm13, %v3920_v62 }
 0x221   : > { %3933 = vmatprep.mubr.msk.bf16.mxu1 %vm3931_vm2, %v3932_v38  ;;  %4836 = vmatmul.mubr.bf16.gmra.mxu0 %v6730_v26 }
 0x222   : > { %4855 = vmatprep.mubr.bf16.mxu0 %v5106_v6 }
 0x228   : > { %3936 = vmatmul.mubr.msk.bf16.gmra.mxu1 %vm5986_vm0, %v3926_v58  ;;  %v5133_v58 = vld [vmem:[#allocation8 + $0x190] sm:$0xff]  }
 0x229   : > { %v4231_v13 = vpop.f32.mrf.mxu0  ;;  %4856 = vmatmul.mubr.bf16.vlgmr.msra.gmra.mxu0 %v5107_v9  ;;  %4522 = vmatpush3.bf16.msra.mxu1 %v5133_v58 }
 0x22a   : > { %4859 = vmatprep.mubr.bf16.mxu0 %v5108_v11 }
 0x22b   : > { %v4232_v17 = vpop.f32.mrf.mxu0 }
 0x22c   : > { %v4233_v16 = vadd.f32 %v4232_v17, %v4231_v13  ;;  %v5117_v13 = vld [vmem:[%s5570_s28 + $0x158] sm:$0xff]  }
 0x22d   : > { %v4234_v52 = vpop.f32.mrf.mxu0 }
 0x22f   : > { %v4235_v22 = vpop.f32.mrf.mxu0 }
 0x230   : > { %v6007_v23 = vadd.f32 %v4235_v22, %v4234_v52  ;;  %v4761_v53 = vpop.f32.mrf.mxu1 }
 0x231   : > { %v4237_v25 = vpop.f32.mrf.mxu0  ;;  %4860 = vmatmul.mubr.bf16.gmra.mxu0 %v5109_v18 }
 0x232   : > { %v1975_v27 = vpop.f32.mrf.mxu1  ;;  %4863 = vmatprep.mubr.bf16.mxu0 %v5110_v20 }
 0x233   : > { %v6009_v28 = vadd.f32 %v4233_v16, %v1975_v27  ;;  %v4238_v29 = vpop.f32.mrf.mxu0  ;;  %v5120_v16 = vld [vmem:[%s5570_s28 + $0x160] sm:$0xff]  }
 0x234   : > { %v4239_v49 = vadd.f32 %v4238_v29, %v4237_v25  ;;  %v4762_v31 = vpop.f32.mrf.mxu1 }
 0x235   : > { %v4240_v32 = vpop.f32.mrf.mxu0 }
 0x236   : > { %v6012_v36 = vadd.f32 %v4761_v53, %v4239_v49  ;;  %v6014_v37 = vpop.f32.mrf.mxu1  ;;  %v5121_v49 = vld [vmem:[%s5570_s28 + $0x168] sm:$0xff]  }
 0x237   : > { %v4241_v39 = vpop.f32.mrf.mxu0 }
 0x238   : > { %v4242_v7 = vadd.f32 %v4241_v39, %v4240_v32  ;;  %v4765_v41 = vpop.f32.mrf.mxu1  ;;  %v5134_v39 = vld [vmem:[#allocation8 + $0x1c8] sm:$0xff]  }
 0x239   : > { %v4243_v43 = vpop.f32.mrf.mxu0  ;;  %4864 = vmatmul.mubr.bf16.gmra.mxu0 %v5111_v34  ;;  %v5124_v34 = vld [vmem:[%s5570_s28 + $0x170] sm:$0xff]   ;;  %4523 = vmatprep.subr.bf16.mxu1 %v5134_v39 }
 0x23a   : > { %v6017_v45 = vadd.f32 %v4762_v31, %v4242_v7  ;;  %v1991_v46 = vpop.f32.mrf.mxu1  ;;  %4867 = vmatprep.mubr.bf16.mxu0 %v5112_v14 }
 0x23b   : > { %v4244_v10 = vpop.f32.mrf.mxu0 }
 0x23c   : > { %v4245_v48 = vadd.f32 %v4244_v10, %v4243_v43  ;;  %v4766_v50 = vpop.f32.mrf.mxu1 }
 0x23d   : > { %v4246_v51 = vpop.f32.mrf.mxu0 }
 0x23e   : > { %v6020_v3 = vadd.f32 %v4245_v48, %v1991_v46  ;;  %v6022_v54 = vpop.f32.mrf.mxu1 }
 0x23f   : > { %v4247_v55 = vpop.f32.mrf.mxu0 }
 0x240   : > { %v6025_v56 = vadd.f32 %v4247_v55, %v4246_v51  ;;  %v4769_v59 = vpop.f32.mrf.mxu1  ;;  %v5136_v51 = vld [vmem:[#allocation8 + $0x238] sm:$0xff]  }
 0x241   : > { %v4249_v60 = vpop.f32.mrf.mxu0  ;;  %4868 = vmatmul.mubr.bf16.gmra.mxu0 %v5113_v33  ;;  %4887 = vmatprep.subr.bf16.mxu0 %v5136_v51 }
 0x242   : > { %v2007_v61 = vpop.f32.mrf.mxu1  ;;  %4871 = vmatprep.mubr.bf16.mxu0 %v5114_v21  ;;  %v5125_v21 = vld [vmem:[%s5570_s28 + $0x178] sm:$0xff]   ;;  %4888 = vmatpush3.bf16.msra.mxu0 %v5136_v51  ;;  %s5269_s28 = scalar_lea.vmem %s5268_s9, 8192 }
 0x243   : > { %v4250_v62 = vpop.f32.mrf.mxu0  ;;  %p5271_p13 = scmp.lt.s32.totalorder %s5269_s28, %s5263_s13 }
 0x244   : > { %v4251_v24 = vadd.f32 %v4250_v62, %v4249_v60  ;;  %v4770_v63 = vpop.f32.mrf.mxu1  ;;  %v5137_v62 = vld [vmem:[#allocation8 + $0x230] sm:$0xff]  }
 0x245   : > { %v4252_v0 = vpop.f32.mrf.mxu0  ;;  %4889 = vmatprep.subr.bf16.mxu0 %v5137_v62  ;;  %p5272_p1 = por %p5271_p13, %p5270_p9 }
 0x246   : > { %v6028_v47 = vadd.f32 %v4765_v41, %v4251_v24  ;;  %v6030_v4 = vpop.f32.mrf.mxu1  ;;  %v5135_v41 = vld [vmem:[#allocation8 + $0x188] sm:$0xff]   ;;  %4890 = vmatpush3.bf16.msra.mxu0 %v5137_v62 }
 0x247   : > { %v4253_v30 = vpop.f32.mrf.mxu0  ;;  %4524 = vmatpush3.bf16.msra.mxu1 %v5135_v41  ;;  %p5273_p4 = pnand %p5272_p1, %p5266_p2 }
 0x248   : > { %v4254_v35 = vadd.f32 %v4253_v30, %v4252_v0  ;;  %v6033_v2 = vpop.f32.mrf.mxu1  ;;  %v5139_v30 = vld [vmem:[#allocation8 + $0x228] sm:$0xff]  }
 0x249   : > { %v4255_v8 = vpop.f32.mrf.mxu0  ;;  %4872 = vmatmul.mubr.bf16.gmra.mxu0 %v5115_v44  ;;  %4891 = vmatprep.subr.bf16.mxu0 %v5139_v30 }
 0x24a   : > { %v6035_v38 = vadd.f32 %v4766_v50, %v4254_v35  ;;  %v2023_v1 = vpop.f32.mrf.mxu1  ;;  %4875 = vmatprep.mubr.bf16.mxu0 %v5116_v5  ;;  %4892 = vmatpush3.bf16.msra.mxu0 %v5139_v30 }
 0x24b   : > { %v4256_v6 = vpop.f32.mrf.mxu0 }
 0x24c   : > { %v4257_v9 = vadd.f32 %v4256_v6, %v4255_v8  ;;  %v6037_v11 = vpop.f32.mrf.mxu1 }
 0x24d   : > { %v6039_v12 = vpop.f32.mrf.mxu0 }
 0x24e   : > { %v6042_v15 = vadd.f32 %v4257_v9, %v2007_v61  ;;  %v6044_v17 = vpop.f32.mrf.mxu1 }
 0x24f   : > { %v6047_v52 = vpop.f32.mrf.mxu0 }
 0x250   : > { %v6049_v18 = vpop.f32.mrf.mxu1 }
 0x251   : > { %v4261_v20 = vpop.f32.mrf.mxu0  ;;  %4876 = vmatmul.mubr.bf16.gmra.mxu0 %v5117_v13  ;;  %v5141_v13 = vld [vmem:[#allocation8 + $0x220] sm:$0xff]  }
 0x252   : > { %v6051_v22 = vpop.f32.mrf.mxu1  ;;  %4879 = vmatprep.mubr.bf16.mxu0 %v5120_v16  ;;  %4893 = vmatprep.subr.bf16.mxu0 %v5141_v13 }
 0x253   : > { %v4262_v53 = vpop.f32.mrf.mxu0  ;;  %4894 = vmatpush3.bf16.msra.mxu0 %v5141_v13 }
 0x254   : > { %v4263_v25 = vadd.f32 %v4262_v53, %v4261_v20  ;;  %v6053_v27 = vpop.f32.mrf.mxu1 }
 0x255   : > { %v4264_v29 = vpop.f32.mrf.mxu0 }
 0x256   : > { %v6056_v31 = vadd.f32 %v4769_v59, %v4263_v25  ;;  %v6058_v32 = vpop.f32.mrf.mxu1  ;;  %v5140_v25 = vld [vmem:[#allocation8 + $0x180] sm:$0xff]  }
 0x257   : > { %v4265_v14 = vpop.f32.mrf.mxu0 }
 0x258   : > { %v4266_v40 = vadd.f32 %v4265_v14, %v4264_v29  ;;  %v6061_v7 = vpop.f32.mrf.mxu1 }
 0x259   : > { %v4267_v42 = vpop.f32.mrf.mxu0  ;;  %4880 = vmatmul.mubr.bf16.gmra.mxu0 %v5121_v49 }
 0x25a   : > { %v6063_v43 = vadd.f32 %v4770_v63, %v4266_v40  ;;  %v6065_v46 = vpop.f32.mrf.mxu1  ;;  %4883 = vmatprep.mubr.bf16.mxu0 %v5124_v34  ;;  %v5142_v34 = vld [vmem:[#allocation8 + $0x218] sm:$0xff]  }
 0x25b   : > { %v4268_v10 = vpop.f32.mrf.mxu0  ;;  %4895 = vmatprep.subr.bf16.mxu0 %v5142_v34 }
 0x25c   : > { %v4269_v48 = vadd.f32 %v4268_v10, %v4267_v42  ;;  %v6067_v50 = vpop.f32.mrf.mxu1  ;;  %4896 = vmatpush3.bf16.msra.mxu0 %v5142_v34  ;;  %v5143_v42 = vld [vmem:[#allocation8 + $0x210] sm:$0xff]  }
 0x25d   : > { %v6069_v33 = vpop.f32.mrf.mxu0  ;;  %4897 = vmatprep.subr.bf16.mxu0 %v5143_v42 }
 0x25e   : > { %v6072_v55 = vadd.f32 %v4269_v48, %v2023_v1  ;;  %v6074_v59 = vpop.f32.mrf.mxu1  ;;  %v5138_v1 = vld [vmem:[#allocation8 + $0x1c0] sm:$0xff]  }
 0x25f   : > { %v6076_v60 = vpop.f32.mrf.mxu0  ;;  %4525 = vmatprep.subr.bf16.mxu1 %v5138_v1 }
 0x260   : > { %v6078_v61 = vpop.f32.mrf.mxu1  ;;  %4526 = vmatpush3.bf16.msra.mxu1 %v5140_v25  ;;  %4898 = vmatpush3.bf16.msra.mxu0 %v5143_v42 }
 0x261   : > { %v4273_v24 = vpop.f32.mrf.mxu0  ;;  %4884 = vmatmul.mubr.bf16.gmra.mxu0 %v5125_v21 }
 0x262   : > { %v6080_v63 = vpop.f32.mrf.mxu1 }
 0x263   : > { %v4274_v0 = vpop.f32.mrf.mxu0 }
 0x264   : > { %v4275_v44 = vadd.f32 %v4274_v0, %v4273_v24  ;;  %v6082_v5 = vpop.f32.mrf.mxu1  ;;  %v5144_v0 = vld [vmem:[#allocation8 + $0x208] sm:$0xff]  }
 0x265   : > { %v4276_v57 = vpop.f32.mrf.mxu0  ;;  %4899 = vmatprep.subr.bf16.mxu0 %v5144_v0 }
 0x266   : > { %v6085_v35 = vadd.f32 %v6033_v2, %v4275_v44  ;;  %v6087_v58 = vpop.f32.mrf.mxu1  ;;  %4900 = vmatpush3.bf16.msra.mxu0 %v5144_v0 }
 0x267   : > { %v4277_v8 = vpop.f32.mrf.mxu0 }
 0x268   : > { %v4278_v6 = vadd.f32 %v4277_v8, %v4276_v57  ;;  %v6089_v9 = vpop.f32.mrf.mxu1  ;;  %v1979_v8 = vadd.f32 %v6007_v23, %v6014_v37 }
 0x269   : > { %v4279_v16 = vpop.f32.mrf.mxu0 }
 0x26a   : > { %v6092_v20 = vadd.f32 %v6037_v11, %v4278_v6  ;;  %v6094_v53 = vpop.f32.mrf.mxu1 }
 0x26b   : > { %v4280_v2 = vpop.f32.mrf.mxu0 }
 0x26c   : > { %v4281_v29 = vadd.f32 %v4280_v2, %v4279_v16  ;;  %v6096_v49 = vpop.f32.mrf.mxu1  ;;  %v5145_v2 = vld [vmem:[#allocation8 + $0x200] sm:$0xff]  }
 0x26d   : > { %v6098_v14 = vpop.f32.mrf.mxu0  ;;  %4901 = vmatprep.subr.bf16.mxu0 %v5145_v2 }
 0x26e   : > { %v6101_v39 = vadd.f32 %v4281_v29, %v6051_v22  ;;  %v6103_v40 = vpop.f32.mrf.mxu1  ;;  %4902 = vmatpush3.bf16.msra.mxu0 %v5145_v2  ;;  %v1995_v2 = vadd.f32 %v6025_v56, %v6022_v54 }
 0x26f   : > { %v6105_v11 = vpop.f32.mrf.mxu0 }
 0x270   : > { %v4367_v41 = vpop.f32.mrf.mxu1 }
 0x271   : > { %v4285_v10 = vpop.f32.mrf.mxu0 }
 0x272   : > { %v4368_v48 = vpop.f32.mrf.mxu1 }
 0x273   : > { %v4369_v51 = vadd.f32 %v4368_v48, %v4367_v41  ;;  %v4286_v21 = vpop.f32.mrf.mxu0 }
 0x274   : > { %v4287_v62 = vadd.f32 %v4286_v21, %v4285_v10  ;;  %v4370_v24 = vpop.f32.mrf.mxu1 }
 0x275   : > { %v4288_v44 = vpop.f32.mrf.mxu0  ;;  %v6108_v22 = vadd.f32 %v4369_v51, %v6009_v28 }
 0x276   : > { %v6111_v30 = vadd.f32 %v6049_v18, %v4287_v62  ;;  %v4371_v57 = vpop.f32.mrf.mxu1 }
 0x277   : > { %v4372_v1 = vadd.f32 %v4371_v57, %v4370_v24  ;;  %v4289_v6 = vpop.f32.mrf.mxu0 }
 0x278   : > { %v4290_v13 = vadd.f32 %v4289_v6, %v4288_v44  ;;  %v4373_v16 = vpop.f32.mrf.mxu1 }
 0x279   : > { %v4291_v25 = vpop.f32.mrf.mxu0  ;;  %v6115_v29 = vadd.f32 %v4372_v1, %v1979_v8 }
 0x27a   : > { %v6118_v28 = vadd.f32 %v6053_v27, %v4290_v13  ;;  %v4374_v34 = vpop.f32.mrf.mxu1 }
 0x27b   : > { %v4375_v18 = vadd.f32 %v4374_v34, %v4373_v16  ;;  %v4292_v41 = vpop.f32.mrf.mxu0 }
 0x27c   : > { %v4293_v42 = vadd.f32 %v4292_v41, %v4291_v25  ;;  %v4376_v10 = vpop.f32.mrf.mxu1 }
 0x27d   : > { %v6120_v23 = vpop.f32.mrf.mxu0  ;;  %v6123_v37 = vadd.f32 %v4375_v18, %v6012_v36 }
 0x27e   : > { %v6126_v48 = vadd.f32 %v4293_v42, %v6065_v46  ;;  %v4377_v51 = vpop.f32.mrf.mxu1 }
 0x27f   : > { %v4378_v21 = vadd.f32 %v4377_v51, %v4376_v10  ;;  %v6128_v62 = vpop.f32.mrf.mxu0 }
 0x280   : > { %v4379_v27 = vpop.f32.mrf.mxu1 }
 0x281   : > { %v4297_v24 = vpop.f32.mrf.mxu0  ;;  %v6131_v0 = vadd.f32 %v4378_v21, %v6017_v45 }
 0x282   : > { %v4380_v44 = vpop.f32.mrf.mxu1 }
 0x283   : > { %v4381_v57 = vadd.f32 %v4380_v44, %v4379_v27  ;;  %v4298_v8 = vpop.f32.mrf.mxu0 }
 0x284   : > { %v4299_v1 = vadd.f32 %v4298_v8, %v4297_v24  ;;  %v4382_v6 = vpop.f32.mrf.mxu1 }
 0x285   : > { %v4300_v13 = vpop.f32.mrf.mxu0  ;;  %v6134_v36 = vadd.f32 %v4381_v57, %v6020_v3 }
 0x286   : > { %v6137_v46 = vadd.f32 %v6061_v7, %v4299_v1  ;;  %v4383_v16 = vpop.f32.mrf.mxu1 }
 0x287   : > { %v4384_v25 = vadd.f32 %v4383_v16, %v4382_v6  ;;  %v4301_v34 = vpop.f32.mrf.mxu0 }
 0x288   : > { %v4302_v45 = vadd.f32 %v4301_v34, %v4300_v13  ;;  %v4385_v18 = vpop.f32.mrf.mxu1 }
 0x289   : > { %v4303_v41 = vpop.f32.mrf.mxu0  ;;  %v6141_v42 = vadd.f32 %v4384_v25, %v1995_v2  ;;  %v4260_v2 = vadd.f32 %v6047_v52, %v6039_v12 }
 0x28a   : > { %v6144_v10 = vadd.f32 %v6067_v50, %v4302_v45  ;;  %v4386_v51 = vpop.f32.mrf.mxu1 }
 0x28b   : > { %v4387_v3 = vadd.f32 %v4386_v51, %v4385_v18  ;;  %v4304_v21 = vpop.f32.mrf.mxu0 }
 0x28c   : > { %v4305_v27 = vadd.f32 %v4304_v21, %v4303_v41  ;;  %v4388_v7 = vpop.f32.mrf.mxu1 }
 0x28d   : > { %v4306_v24 = vpop.f32.mrf.mxu0  ;;  %v6147_v44 = vadd.f32 %v4387_v3, %v6028_v47  ;;  %v2011_v3 = vadd.f32 %v4260_v2, %v6030_v4 }
 0x28e   : > { %v6150_v54 = vadd.f32 %v4305_v27, %v6080_v63  ;;  %v4389_v56 = vpop.f32.mrf.mxu1 }
 0x28f   : > { %v4390_v57 = vadd.f32 %v4389_v56, %v4388_v7  ;;  %v4307_v8 = vpop.f32.mrf.mxu0 }
 0x290   : > { %v6152_v1 = vadd.f32 %v4307_v8, %v4306_v24  ;;  %v4391_v6 = vpop.f32.mrf.mxu1 }
 0x291   : > { %v4309_v50 = vpop.f32.mrf.mxu0  ;;  %v6155_v13 = vadd.f32 %v4390_v57, %v6035_v38 }
 0x292   : > { %v4392_v16 = vpop.f32.mrf.mxu1 }
 0x293   : > { %v4393_v25 = vadd.f32 %v4392_v16, %v4391_v6  ;;  %v4310_v47 = vpop.f32.mrf.mxu0 }
 0x294   : > { %v4311_v34 = vadd.f32 %v4310_v47, %v4309_v50  ;;  %v4394_v45 = vpop.f32.mrf.mxu1 }
 0x295   : > { %v4312_v63 = vpop.f32.mrf.mxu0  ;;  %v6160_v18 = vadd.f32 %v4393_v25, %v6042_v15 }
 0x296   : > { %v6163_v41 = vadd.f32 %v6078_v61, %v4311_v34  ;;  %v4395_v51 = vpop.f32.mrf.mxu1 }
 0x297   : > { %v4396_v38 = vadd.f32 %v4395_v51, %v4394_v45  ;;  %v4313_v21 = vpop.f32.mrf.mxu0  ;;  %v4272_v51 = vadd.f32 %v6076_v60, %v6069_v33 }
 0x298   : > { %v4314_v27 = vadd.f32 %v4313_v21, %v4312_v63  ;;  %v4397_v7 = vpop.f32.mrf.mxu1 }
 0x299   : > { %v4315_v24 = vpop.f32.mrf.mxu0  ;;  %v6166_v12 = vadd.f32 %v4396_v38, %v2011_v3 }
 0x29a   : > { %v6169_v52 = vadd.f32 %v6082_v5, %v4314_v27  ;;  %v4398_v56 = vpop.f32.mrf.mxu1 }
 0x29b   : > { %v4399_v57 = vadd.f32 %v4398_v56, %v4397_v7  ;;  %v4316_v15 = vpop.f32.mrf.mxu0  ;;  %v2027_v56 = vadd.f32 %v4272_v51, %v6044_v17 }
 0x29c   : > { %v4317_v8 = vadd.f32 %v4316_v15, %v4315_v24  ;;  %v4400_v6 = vpop.f32.mrf.mxu1 }
 0x29d   : > { %v4318_v61 = vpop.f32.mrf.mxu0  ;;  %v2321_v50 = vadd.f32 %v4399_v57, %v6056_v31 }
 0x29e   : > { %v6173_v4 = vadd.f32 %v4317_v8, %v6094_v53  ;;  %v4401_v16 = vpop.f32.mrf.mxu1 }
 0x29f   : > { %v4402_v2 = vadd.f32 %v4401_v16, %v4400_v6  ;;  %v4319_v25 = vpop.f32.mrf.mxu0 }
 0x2a0   : > { %v6175_v47 = vadd.f32 %v4319_v25, %v4318_v61  ;;  %v4403_v34 = vpop.f32.mrf.mxu1 }
 0x2a1   : > { %v4321_v45 = vpop.f32.mrf.mxu0  ;;  %v2324_v5 = vadd.f32 %v4402_v2, %v6063_v43 }
 0x2a2   : > { %v4404_v63 = vpop.f32.mrf.mxu1 }
 0x2a3   : > { %v4405_v3 = vadd.f32 %v4404_v63, %v4403_v34  ;;  %v4322_v38 = vpop.f32.mrf.mxu0 }
 0x2a4   : > { %v4323_v21 = vadd.f32 %v4322_v38, %v4321_v45  ;;  %v4406_v31 = vpop.f32.mrf.mxu1 }
 0x2a5   : > { %v4324_v27 = vpop.f32.mrf.mxu0  ;;  %v6181_v53 = vadd.f32 %v4405_v3, %v6072_v55 }
 0x2a6   : > { %v6184_v7 = vadd.f32 %v6089_v9, %v4323_v21  ;;  %v4407_v24 = vpop.f32.mrf.mxu1 }
 0x2a7   : > { %v4408_v57 = vadd.f32 %v4407_v24, %v4406_v31  ;;  %v4325_v43 = vpop.f32.mrf.mxu0 }
 0x2a8   : > { %v4326_v15 = vadd.f32 %v4325_v43, %v4324_v27  ;;  %v4409_v8 = vpop.f32.mrf.mxu1 }
 0x2a9   : > { %v4809_v6 = vpop.f32.mrf.mxu0  ;;  %v6187_v33 = vadd.f32 %v4408_v57, %v2027_v56 }
 0x2aa   : > { %v6190_v60 = vadd.f32 %v6096_v49, %v4326_v15  ;;  %v6193_v61 = vadd.f32 %v4809_v6, %v6123_v37  ;;  %v4410_v55 = vpop.f32.mrf.mxu1 }
 0x2ab   : > { %v4411_v16 = vadd.f32 %v4410_v55, %v4409_v8  ;;  %v2441_v9 = vpop.f32.mrf.mxu0 }
 0x2ac   : > { %v6196_v2 = vadd.f32 %v2441_v9, %v6108_v22  ;;  %v4412_v17 = vpop.f32.mrf.mxu1 }
 0x2ad   : > { %v4810_v25 = vpop.f32.mrf.mxu0  ;;  %v2337_v34 = vadd.f32 %v4411_v16, %v6085_v35  ;;  %v4284_v35 = vadd.f32 %v6105_v11, %v6098_v14 }
 0x2ae   : > { %v6200_v45 = vadd.f32 %v4810_v25, %v6131_v0  ;;  %v4413_v63 = vpop.f32.mrf.mxu1 }
 0x2af   : > { %v4414_v51 = vadd.f32 %v4413_v63, %v4412_v17  ;;  %v2444_v49 = vpop.f32.mrf.mxu0 }
 0x2b0   : > { %v6203_v3 = vadd.f32 %v2444_v49, %v6115_v29  ;;  %v4415_v37 = vpop.f32.mrf.mxu1 }
 0x2b1   : > { %v4813_v38 = vpop.f32.mrf.mxu0  ;;  %v2340_v21 = vadd.f32 %v4414_v51, %v6092_v20 }
 0x2b2   : > { %v6207_v22 = vadd.f32 %v4813_v38, %v6147_v44  ;;  %v4416_v31 = vpop.f32.mrf.mxu1  ;;  %v2043_v44 = vadd.f32 %v4284_v35, %v6058_v32 }
 0x2b3   : > { %v4417_v27 = vadd.f32 %v4416_v31, %v4415_v37  ;;  %v2457_v0 = vpop.f32.mrf.mxu0 }
 0x2b4   : > { %v6212_v24 = vadd.f32 %v2457_v0, %v6134_v36  ;;  %v4418_v56 = vpop.f32.mrf.mxu1 }
 0x2b5   : > { %v4814_v57 = vpop.f32.mrf.mxu0  ;;  %v2345_v29 = vadd.f32 %v4417_v27, %v6101_v39  ;;  %v4296_v27 = vadd.f32 %v6128_v62, %v6120_v23 }
 0x2b6   : > { %v6216_v43 = vadd.f32 %v4814_v57, %v6155_v13  ;;  %v4419_v20 = vpop.f32.mrf.mxu1 }
 0x2b7   : > { %v4420_v15 = vadd.f32 %v4419_v20, %v4418_v56  ;;  %v2460_v8 = vpop.f32.mrf.mxu0 }
 0x2b8   : > { %v6220_v6 = vadd.f32 %v2460_v8, %v6141_v42  ;;  %v4421_v14 = vpop.f32.mrf.mxu1 }
 0x2b9   : > { %v4817_v11 = vpop.f32.mrf.mxu0  ;;  %v2348_v55 = vadd.f32 %v4420_v15, %v2043_v44 }
 0x2ba   : > { %v6222_v36 = vadd.f32 %v4817_v11, %v2321_v50  ;;  %v4422_v16 = vpop.f32.mrf.mxu1 }
 0x2bb   : > { %v4423_v9 = vadd.f32 %v4422_v16, %v4421_v14  ;;  %v2473_v17 = vpop.f32.mrf.mxu0 }
 0x2bc   : > { %v6225_v39 = vadd.f32 %v2473_v17, %v6160_v18  ;;  %v4424_v13 = vpop.f32.mrf.mxu1 }
 0x2bd   : > { %v4818_v25 = vpop.f32.mrf.mxu0  ;;  %v2353_v32 = vadd.f32 %v4423_v9, %v6111_v30 }
 0x2be   : > { %v6228_v63 = vadd.f32 %v4818_v25, %v2324_v5  ;;  %v4425_v51 = vpop.f32.mrf.mxu1 }
 0x2bf   : > { %v4426_v42 = vadd.f32 %v4425_v51, %v4424_v13  ;;  %v2476_v49 = vpop.f32.mrf.mxu0 }
 0x2c0   : > { %v6231_v37 = vadd.f32 %v2476_v49, %v6166_v12  ;;  %v4427_v50 = vpop.f32.mrf.mxu1 }
 0x2c1   : > { %v4821_v38 = vpop.f32.mrf.mxu0  ;;  %v2356_v31 = vadd.f32 %v4426_v42, %v6118_v28  ;;  %v2059_v28 = vadd.f32 %v4296_v27, %v6074_v59 }
 0x2c2   : > { %v6234_v35 = vadd.f32 %v4821_v38, %v2337_v34  ;;  %v4428_v18 = vpop.f32.mrf.mxu1 }
 0x2c3   : > { %v4429_v0 = vadd.f32 %v4428_v18, %v4427_v50  ;;  %v2489_v30 = vpop.f32.mrf.mxu0 }
 0x2c4   : > { %v6239_v5 = vadd.f32 %v2489_v30, %v6181_v53  ;;  %v4430_v56 = vpop.f32.mrf.mxu1 }
 0x2c5   : > { %v4822_v57 = vpop.f32.mrf.mxu0  ;;  %v2361_v12 = vadd.f32 %v4429_v0, %v6126_v48 }
 0x2c6   : > { %v6242_v20 = vadd.f32 %v4822_v57, %v2340_v21  ;;  %v4431_v44 = vpop.f32.mrf.mxu1 }
 0x2c7   : > { %v4432_v34 = vadd.f32 %v4431_v44, %v4430_v56  ;;  %v2492_v15 = vpop.f32.mrf.mxu0 }
 0x2c8   : > { %v6246_v8 = vadd.f32 %v2492_v15, %v6187_v33  ;;  %v4433_v23 = vpop.f32.mrf.mxu1 }
 0x2c9   : > { %v4825_v62 = vpop.f32.mrf.mxu0  ;;  %v2364_v14 = vadd.f32 %v4432_v34, %v2059_v28 }
 0x2ca   : > { %v6248_v11 = vadd.f32 %v4825_v62, %v2353_v32  ;;  %v4434_v53 = vpop.f32.mrf.mxu1 }
 0x2cb   : > { %v4435_v16 = vadd.f32 %v4434_v53, %v4433_v23  ;;  %v2505_v9 = vpop.f32.mrf.mxu0 }
 0x2cc   : > { %v6250_v17 = vadd.f32 %v2505_v9, %v2345_v29  ;;  %v4436_v48 = vpop.f32.mrf.mxu1 }
 0x2cd   : > { %v4826_v21 = vpop.f32.mrf.mxu0  ;;  %v2369_v13 = vadd.f32 %v4435_v16, %v6137_v46 }
 0x2ce   : > { %v6253_v59 = vadd.f32 %v4826_v21, %v2356_v31  ;;  %v4437_v25 = vpop.f32.mrf.mxu1 }
 0x2cf   : > { %v4438_v51 = vadd.f32 %v4437_v25, %v4436_v48  ;;  %v2508_v33 = vpop.f32.mrf.mxu0 }
 0x2d0   : > { %v6255_v42 = vadd.f32 %v2508_v33, %v2348_v55  ;;  %v4439_v49 = vpop.f32.mrf.mxu1  ;;  %v2075_v55 = vadd.f32 %v6152_v1, %v6087_v58 }
 0x2d1   : > { %v4829_v50 = vpop.f32.mrf.mxu0  ;;  %v2372_v32 = vadd.f32 %v4438_v51, %v6144_v10 }
 0x2d2   : > { %v6258_v38 = vadd.f32 %v4829_v50, %v2369_v13  ;;  %v4440_v18 = vpop.f32.mrf.mxu1 }
 0x2d3   : > { %v4441_v29 = vadd.f32 %v4440_v18, %v4439_v49  ;;  %v2521_v27 = vpop.f32.mrf.mxu0 }
 0x2d4   : > { %v6260_v0 = vadd.f32 %v2521_v27, %v2361_v12  ;;  %v4442_v30 = vpop.f32.mrf.mxu1 }
 0x2d5   : > { %v4830_v46 = vpop.f32.mrf.mxu0  ;;  %v2377_v31 = vadd.f32 %v4441_v29, %v6150_v54 }
 0x2d6   : > { %v6263_v56 = vadd.f32 %v4830_v46, %v2372_v32  ;;  %v4443_v57 = vpop.f32.mrf.mxu1  ;;  %v317_v46 = vadd.s32 24, %v5718_v19 }
 0x2d7   : > { %v4444_v44 = vadd.f32 %v4443_v57, %v4442_v30  ;;  %v2524_v28 = vpop.f32.mrf.mxu0 }
 0x2d8   : > { %v6267_v10 = vadd.f32 %v2524_v28, %v2364_v14  ;;  %v4445_v34 = vpop.f32.mrf.mxu1 }
 0x2d9   : > { %v4833_v15 = vpop.f32.mrf.mxu0  ;;  %v2380_v23 = vadd.f32 %v4444_v44, %v2075_v55  ;;  %v315_v44 = vadd.s32 8, %v5718_v19 }
 0x2da   : > { %v4446_v62 = vpop.f32.mrf.mxu1 }
 0x2db   : > { %v4447_v12 = vadd.f32 %v4446_v62, %v4445_v34  ;;  %v2537_v53 = vpop.f32.mrf.mxu0  ;;  %v371_v62 = vand.u32 15, %v317_v46 }
 0x2dc   : > { %v6269_v16 = vadd.f32 %v2537_v53, %v2377_v31  ;;  %v4448_v9 = vpop.f32.mrf.mxu1  ;;  %v2091_v31 = vadd.f32 %v6175_v47, %v6103_v40  ;;  %v6291_v40 = vld [vmem:[%s6723_s3] ss:$0 sm:$0xff] }
 0x2dd   : > { %v2385_v54 = vadd.f32 %v4447_v12, %v6163_v41  ;;  %v4834_v48 = vpop.f32.mrf.mxu0  ;;  %vm2892_vm3 = vcmp.lt.s32.totalorder %v371_v62, 15 }
 0x2de   : > { %v4449_v21 = vpop.f32.mrf.mxu1  ;;  %vm6307_vm5 = vmpackc.low %vm2892_vm3, %vm5350_vm1 }
 0x2df   : > { %v6272_v13 = vadd.f32 %v4833_v15, %v2385_v54  ;;  %v4450_v58 = vadd.f32 %v4449_v21, %v4448_v9  ;;  %v2540_v1 = vpop.f32.mrf.mxu0  ;;  %v357_v9 = vand.u32 15, %v315_v44 }
 0x2e0   : > { %v6274_v25 = vadd.f32 %v2540_v1, %v2380_v23  ;;  %v4451_v14 = vpop.f32.mrf.mxu1 }
 0x2e1   : > { %v2388_v51 = vadd.f32 %v4450_v58, %v6169_v52  ;;  %v4837_v33 = vpop.f32.mrf.mxu0  ;;  %vm6299_vm4 = vcmp.lt.s32.totalorder %v357_v9, 15 }
 0x2e2   : > { %v4452_v49 = vpop.f32.mrf.mxu1  ;;  %vm6320_vm6 = vmpackc.low %vm6299_vm4, %vm5350_vm1 }
 0x2e3   : > { %v6277_v50 = vadd.f32 %v4834_v48, %v2388_v51  ;;  %v4453_v32 = vadd.f32 %v4452_v49, %v4451_v14  ;;  %v2553_v18 = vpop.f32.mrf.mxu0 }
 0x2e4   : > { %v4454_v29 = vpop.f32.mrf.mxu1 }
 0x2e5   : > { %v2393_v41 = vadd.f32 %v4453_v32, %v6173_v4  ;;  %v4838_v27 = vpop.f32.mrf.mxu0 }
 0x2e6   : > { %v4455_v30 = vpop.f32.mrf.mxu1 }
 0x2e7   : > { %v6283_v57 = vadd.f32 %v2553_v18, %v2393_v41  ;;  %v4456_v55 = vadd.f32 %v4455_v30, %v4454_v29  ;;  %v2556_v52 = vpop.f32.mrf.mxu0 }
 0x2e8   : > { %v4457_v28 = vpop.f32.mrf.mxu1 }
 0x2e9   : > { %v2396_v34 = vadd.f32 %v4456_v55, %v2091_v31  ;;  %v4857_v15 = vpop.f32.mrf.mxu0  ;;  %v333_v55 = vadd.s32 152, %v5718_v19 }
 0x2ea   : > { %v4458_v23 = vpop.f32.mrf.mxu1  ;;  %v2739_v47 = vadd.f32 %v6291_v40, %v4857_v15 }
 0x2eb   : > { %v6286_v12 = vadd.f32 %v2556_v52, %v2396_v34  ;;  %v4459_v4 = vadd.f32 %v4458_v23, %v4457_v28  ;;  %v2730_v53 = vpop.f32.mrf.mxu0 }
 0x2ec   : > { %v4460_v54 = vpop.f32.mrf.mxu1  ;;  %v2731_v58 = vadd.f32 %v6291_v40, %v2730_v53  ;;  %v2859_v29 = vmax.f32 %v2739_v47, 0.0 }
 0x2ed   : > { %v2401_v48 = vadd.f32 %v4459_v4, %v6184_v7  ;;  %v4858_v21 = vpop.f32.mrf.mxu0  ;;  %v319_v7 = vadd.s32 40, %v5718_v19 }
 0x2ee   : > { %v2742_v1 = vadd.f32 %v6291_v40, %v4858_v21  ;;  %v4461_v14 = vpop.f32.mrf.mxu1  ;;  %v2857_v52 = vmax.f32 %v2731_v58, 0.0  ;;  %v323_v21 = vadd.s32 72, %v5718_v19 }
 0x2ef   : > { %v6297_v51 = vadd.f32 %v4837_v33, %v2401_v48  ;;  %v4462_v49 = vadd.f32 %v4461_v14, %v4460_v54  ;;  %v2733_v32 = vpop.f32.mrf.mxu0  ;;  %v321_v33 = vadd.s32 56, %v5718_v19  ;;  %v385_v53 = vand.u32 15, %v319_v7 }
 0x2f0   : > { %v2860_v41 = vmax.f32 %v2742_v1, 0.0  ;;  %v2734_v30 = vadd.f32 %v6291_v40, %v2733_v32  ;;  %v325_v32 = vadd.s32 88, %v5718_v19  ;;  %v337_v7 = vadd.s32 184, %v5718_v19 }
 0x2f1   : > { %v2404_v46 = vadd.f32 %v4462_v49, %v6190_v60  ;;  %v4861_v31 = vpop.f32.mrf.mxu0  ;;  %v399_v9 = vand.u32 15, %v321_v33  ;;  %vm2894_vm7 = vcmp.lt.s32.totalorder %v385_v53, 15  ;;  %v329_v60 = vadd.s32 120, %v5718_v19 }
 0x2f2   : > { %v6312_v44 = vpack.c.bf16 %v2860_v41, %v2859_v29  ;;  %v2858_v28 = vmax.f32 %v2734_v30, 0.0  ;;  %v2755_v15 = vadd.f32 %v6291_v40, %v4861_v31  ;;  %vm6342_vm9 = vmpackc.low %vm2894_vm7, %vm5350_vm1 }
 0x2f3   : > { %v6314_v34 = vadd.f32 %v4838_v27, %v2404_v46  ;;  %v2746_v23 = vpop.f32.mrf.mxu0  ;;  %vm2896_vm8 = vcmp.lt.s32.totalorder %v399_v9, 15  ;;  %v413_v46 = vand.u32 15, %v323_v21 }
 0x2f4   : > { %v4023_v62 = vpack.c.bf16 %v2858_v28, %v2857_v52  ;;  %v2747_v4 = vadd.f32 %v6291_v40, %v2746_v23  ;;  %4903 = vmatprep.mubr.msk.bf16.mxu0 %vm6307_vm5, %v6312_v44  ;;  %v2863_v54 = vmax.f32 %v2755_v15, 0.0  ;;  %vm6348_vm10 = vmpackc.low %vm2896_vm8, %vm5350_vm1  ;;  %v427_v15 = vand.u32 15, %v325_v32 }
 0x2f5   : > { %v4862_v27 = vpop.f32.mrf.mxu0  ;;  %vm2898_vm11 = vcmp.lt.s32.totalorder %v413_v46, 15  ;;  %v455_v46 = vand.u32 15, %v329_v60 }
 0x2f6   : > { %v2758_v47 = vadd.f32 %v6291_v40, %v4862_v27  ;;  %4024 = vmatprep.mubr.msk.bf16.mxu1 %vm6320_vm6, %v4023_v62  ;;  %v2861_v58 = vmax.f32 %v2747_v4, 0.0  ;;  %vm2900_vm12 = vcmp.lt.s32.totalorder %v427_v15, 15  ;;  %vm6368_vm13 = vmpackc.low %vm2898_vm11, %vm5350_vm1 }
 0x2f7   : > { %v2749_v48 = vpop.f32.mrf.mxu0  ;;  %3195 = vmatmul.mubr.bf16.vlgmr.msra.gmra.mxu1 %v6730_v26  ;;  %vm6377_vm14 = vmpackc.low %vm2900_vm12, %vm5350_vm1  ;;  %vm2904_vm0 = vcmp.lt.s32.totalorder %v455_v46, 15 }
 0x2f8   : > { %v2864_v1 = vmax.f32 %v2758_v47, 0.0  ;;  %v2750_v14 = vadd.f32 %v6291_v40, %v2749_v48  ;;  %4027 = vmatprep.mubr.msk.bf16.mxu1 %vm6307_vm5, %v6312_v44  ;;  %vm6409_vm3 = vmpackc.low %vm2904_vm0, %vm5350_vm1 }
 0x2f9   : > { %v4865_v49 = vpop.f32.mrf.mxu0 }
 0x2fa   : > { %v2862_v18 = vmax.f32 %v2750_v14, 0.0  ;;  %v6338_v29 = vpack.c.bf16 %v2864_v1, %v2863_v54  ;;  %v2771_v41 = vadd.f32 %v6291_v40, %v4865_v49  ;;  %v327_v54 = vadd.s32 104, %v5718_v19 }
 0x2fb   : > { %v2762_v30 = vpop.f32.mrf.mxu0 }
 0x2fc   : > { %v4032_v31 = vpack.c.bf16 %v2862_v18, %v2861_v58  ;;  %v2763_v33 = vadd.f32 %v6291_v40, %v2762_v30  ;;  %v2867_v4 = vmax.f32 %v2771_v41, 0.0  ;;  %v441_v41 = vand.u32 15, %v327_v54 }
 0x2fd   : > { %v4866_v28 = vpop.f32.mrf.mxu0  ;;  %v345_v58 = vadd.s32 248, %v5718_v19 }
 0x2fe   : > { %4904 = vmatmul.mubr.msk.bf16.vlgmr.msra.gmra.mxu0 %vm6342_vm9, %v4032_v31  ;;  %v2774_v23 = vadd.f32 %v6291_v40, %v4866_v28  ;;  %v2865_v27 = vmax.f32 %v2763_v33, 0.0  ;;  %vm2902_vm15 = vcmp.lt.s32.totalorder %v441_v41, 15 }
 0x2ff   : > { %4030 = vmatmul.mubr.msk.bf16.gmra.mxu1 %vm6320_vm6, %v4023_v62  ;;  %4907 = vmatprep.mubr.msk.bf16.mxu0 %vm6348_vm10, %v6338_v29  ;;  %v2765_v53 = vpop.f32.mrf.mxu0  ;;  %vm6400_vm2 = vmpackc.low %vm2902_vm15, %vm5350_vm1 }
 0x300   : > { %v2868_v9 = vmax.f32 %v2774_v23, 0.0  ;;  %4033 = vmatprep.mubr.msk.bf16.mxu1 %vm6342_vm9, %v4032_v31  ;;  %v2766_v47 = vadd.f32 %v6291_v40, %v2765_v53  ;;  %v331_v23 = vadd.s32 136, %v5718_v19 }
 0x301   : > { %v4869_v48 = vpop.f32.mrf.mxu0 }
 0x302   : > { %v2866_v62 = vmax.f32 %v2766_v47, 0.0  ;;  %v6365_v21 = vpack.c.bf16 %v2868_v9, %v2867_v4  ;;  %v2787_v1 = vadd.f32 %v6291_v40, %v4869_v48 }
 0x303   : > { %v2778_v14 = vpop.f32.mrf.mxu0 }
 0x304   : > { %v6373_v49 = vpack.c.bf16 %v2866_v62, %v2865_v27  ;;  %v2779_v32 = vadd.f32 %v6291_v40, %v2778_v14  ;;  %v2871_v28 = vmax.f32 %v2787_v1, 0.0  ;;  %v469_v62 = vand.u32 15, %v331_v23 }
 0x305   : > { %v4870_v30 = vpop.f32.mrf.mxu0 }
 0x306   : > { %4908 = vmatmul.mubr.msk.bf16.gmra.mxu0 %vm6368_vm13, %v6373_v49  ;;  %v2790_v33 = vadd.f32 %v6291_v40, %v4870_v30  ;;  %v2869_v4 = vmax.f32 %v2779_v32, 0.0  ;;  %v483_v30 = vand.u32 15, %v333_v55  ;;  %vm2906_vm4 = vcmp.lt.s32.totalorder %v469_v62, 15 }
 0x307   : > { %4036 = vmatmul.mubr.msk.bf16.gmra.mxu1 %vm6307_vm5, %v6312_v44  ;;  %4911 = vmatprep.mubr.msk.bf16.mxu0 %vm6377_vm14, %v6365_v21  ;;  %v2781_v15 = vpop.f32.mrf.mxu0  ;;  %vm6431_vm6 = vmpackc.low %vm2906_vm4, %vm5350_vm1 }
 0x308   : > { %4039 = vmatprep.mubr.msk.bf16.mxu1 %vm6348_vm10, %v6338_v29  ;;  %v2872_v53 = vmax.f32 %v2790_v33, 0.0  ;;  %v2782_v27 = vadd.f32 %v6291_v40, %v2781_v15  ;;  %vm2908_vm5 = vcmp.lt.s32.totalorder %v483_v30, 15 }
 0x309   : > { %v4873_v9 = vpop.f32.mrf.mxu0  ;;  %vm6440_vm7 = vmpackc.low %vm2908_vm5, %vm5350_vm1 }
 0x30a   : > { %v2870_v44 = vmax.f32 %v2782_v27, 0.0  ;;  %v6397_v47 = vpack.c.bf16 %v2872_v53, %v2871_v28  ;;  %v2803_v48 = vadd.f32 %v6291_v40, %v4873_v9  ;;  %v335_v53 = vadd.s32 168, %v5718_v19 }
 0x30b   : > { %v2794_v60 = vpop.f32.mrf.mxu0 }
 0x30c   : > { %v6405_v1 = vpack.c.bf16 %v2870_v44, %v2869_v4  ;;  %v2795_v14 = vadd.f32 %v6291_v40, %v2794_v60  ;;  %v2875_v33 = vmax.f32 %v2803_v48, 0.0 }
 0x30d   : > { %v4874_v41 = vpop.f32.mrf.mxu0 }
 0x30e   : > { %4912 = vmatmul.mubr.msk.bf16.gmra.mxu0 %vm6400_vm2, %v6405_v1  ;;  %v2806_v46 = vadd.f32 %v6291_v40, %v4874_v41  ;;  %v2873_v15 = vmax.f32 %v2795_v14, 0.0  ;;  %v497_v41 = vand.u32 15, %v335_v53 }
 0x30f   : > { %4042 = vmatmul.mubr.msk.bf16.gmra.mxu1 %vm6342_vm9, %v4032_v31  ;;  %4915 = vmatprep.mubr.msk.bf16.mxu0 %vm6409_vm3, %v6397_v47  ;;  %v2797_v28 = vpop.f32.mrf.mxu0 }
 0x310   : > { %4045 = vmatprep.mubr.msk.bf16.mxu1 %vm6368_vm13, %v6373_v49  ;;  %v2876_v23 = vmax.f32 %v2806_v46, 0.0  ;;  %v2798_v4 = vadd.f32 %v6291_v40, %v2797_v28  ;;  %v511_v46 = vand.u32 15, %v337_v7  ;;  %vm2910_vm8 = vcmp.lt.s32.totalorder %v497_v41, 15 }
 0x311   : > { %v4877_v27 = vpop.f32.mrf.mxu0 }
 0x312   : > { %v2874_v31 = vmax.f32 %v2798_v4, 0.0  ;;  %v6428_v9 = vpack.c.bf16 %v2876_v23, %v2875_v33  ;;  %v2819_v44 = vadd.f32 %v6291_v40, %v4877_v27  ;;  %v339_v23 = vadd.s32 200, %v5718_v19 }
 0x313   : > { %v2810_v48 = vpop.f32.mrf.mxu0  ;;  %vm2912_vm9 = vcmp.lt.s32.totalorder %v511_v46, 15 }
 0x314   : > { %v6436_v60 = vpack.c.bf16 %v2874_v31, %v2873_v15  ;;  %v2811_v62 = vadd.f32 %v6291_v40, %v2810_v48  ;;  %v2879_v28 = vmax.f32 %v2819_v44, 0.0  ;;  %vm6470_vm11 = vmpackc.low %vm2912_vm9, %vm5350_vm1 }
 0x315   : > { %v4878_v30 = vpop.f32.mrf.mxu0 }
 0x316   : > { %4916 = vmatmul.mubr.msk.bf16.gmra.mxu0 %vm6431_vm6, %v6436_v60  ;;  %v2822_v33 = vadd.f32 %v6291_v40, %v4878_v30  ;;  %v2877_v4 = vmax.f32 %v2811_v62, 0.0  ;;  %v525_v62 = vand.u32 15, %v339_v23 }
 0x317   : > { %4048 = vmatmul.mubr.msk.bf16.gmra.mxu1 %vm6348_vm10, %v6338_v29  ;;  %4919 = vmatprep.mubr.msk.bf16.mxu0 %vm6440_vm7, %v6428_v9  ;;  %v2813_v15 = vpop.f32.mrf.mxu0  ;;  %v341_v29 = vadd.s32 216, %v5718_v19  ;;  %vm6463_vm10 = vmpackc.low %vm2910_vm8, %vm5350_vm1 }
 0x318   : > { %4051 = vmatprep.mubr.msk.bf16.mxu1 %vm6377_vm14, %v6365_v21  ;;  %v2880_v53 = vmax.f32 %v2822_v33, 0.0  ;;  %v2814_v27 = vadd.f32 %v6291_v40, %v2813_v15  ;;  %vm2914_vm12 = vcmp.lt.s32.totalorder %v525_v62, 15 }
 0x319   : > { %v4881_v7 = vpop.f32.mrf.mxu0 }
 0x31a   : > { %v2878_v52 = vmax.f32 %v2814_v27, 0.0  ;;  %v6460_v31 = vpack.c.bf16 %v2880_v53, %v2879_v28  ;;  %v2835_v48 = vadd.f32 %v6291_v40, %v4881_v7  ;;  %v539_v28 = vand.u32 15, %v341_v29 }
 0x31b   : > { %v2826_v30 = vpop.f32.mrf.mxu0 }
 0x31c   : > { %v4080_v33 = vpack.c.bf16 %v2878_v52, %v2877_v4  ;;  %v2827_v15 = vadd.f32 %v6291_v40, %v2826_v30  ;;  %v2883_v23 = vmax.f32 %v2835_v48, 0.0  ;;  %v343_v52 = vadd.s32 232, %v5718_v19 }
 0x31d   : > { %v4882_v46 = vpop.f32.mrf.mxu0  ;;  %vm2916_vm15 = vcmp.lt.s32.totalorder %v539_v28, 15 }
 0x31e   : > { %4920 = vmatmul.mubr.msk.bf16.gmra.mxu0 %vm6463_vm10, %v4080_v33  ;;  %v2838_v53 = vadd.f32 %v6291_v40, %v4882_v46  ;;  %v2881_v27 = vmax.f32 %v2827_v15, 0.0  ;;  %vm6497_vm0 = vmpackc.low %vm2916_vm15, %vm5350_vm1  ;;  %v553_v28 = vand.u32 15, %v343_v52 }
 0x31f   : > { %4054 = vmatmul.mubr.msk.bf16.gmra.mxu1 %vm6368_vm13, %v6373_v49  ;;  %4923 = vmatprep.mubr.msk.bf16.mxu0 %vm6470_vm11, %v6460_v31  ;;  %v2829_v4 = vpop.f32.mrf.mxu0  ;;  %vm6490_vm13 = vmpackc.low %vm2914_vm12, %vm5350_vm1 }
 0x320   : > { %4057 = vmatprep.mubr.msk.bf16.mxu1 %vm6400_vm2, %v6405_v1  ;;  %v2884_v7 = vmax.f32 %v2838_v53, 0.0  ;;  %v2830_v29 = vadd.f32 %v6291_v40, %v2829_v4  ;;  %vm2918_vm4 = vcmp.lt.s32.totalorder %v553_v28, 15 }
 0x321   : > { %v4885_v30 = vpop.f32.mrf.mxu0  ;;  %vm6514_vm8 = vmpackc.low %vm2918_vm4, %vm5350_vm1 }
 0x322   : > { %v2882_v49 = vmax.f32 %v2830_v29, 0.0  ;;  %v4098_v48 = vpack.c.bf16 %v2884_v7, %v2883_v23  ;;  %v2851_v62 = vadd.f32 %v6291_v40, %v4885_v30  ;;  %v567_v29 = vand.u32 15, %v345_v58 }
 0x323   : > { %v2842_v26 = vpop.f32.mrf.mxu0 }
 0x324   : > { %v4092_v15 = vpack.c.bf16 %v2882_v49, %v2881_v27  ;;  %v2843_v53 = vadd.f32 %v6291_v40, %v2842_v26  ;;  %v2887_v27 = vmax.f32 %v2851_v62, 0.0  ;;  %vm2920_vm5 = vcmp.lt.s32.totalorder %v567_v29, 15  ;;  %v3518_v29 = vld [vmem:[%s5580_s7 + $0x10] sm:$0xff] }
 0x325   : > { %v4886_v19 = vpop.f32.mrf.mxu0 }
 0x326   : > { %4924 = vmatmul.mubr.msk.bf16.gmra.mxu0 %vm6490_vm13, %v4092_v15  ;;  %v2854_v23 = vadd.f32 %v6291_v40, %v4886_v19  ;;  %v2885_v7 = vmax.f32 %v2843_v53, 0.0 }
 0x327   : > { %4060 = vmatmul.mubr.msk.bf16.gmra.mxu1 %vm6377_vm14, %v6365_v21  ;;  %4927 = vmatprep.mubr.msk.bf16.mxu0 %vm6497_vm0, %v4098_v48  ;;  %v2845_v26 = vpop.f32.mrf.mxu0  ;;  %vm6519_vm14 = vmpackc.low %vm2920_vm5, %vm5350_vm1 }
 0x328   : > { %4063 = vmatprep.mubr.msk.bf16.mxu1 %vm6409_vm3, %v6397_v47  ;;  %v2888_v52 = vmax.f32 %v2854_v23, 0.0  ;;  %v2846_v30 = vadd.f32 %v6291_v40, %v2845_v26  ;;  %v6814_v40 = vmov 0  }
 0x32a   : > { %v2886_v58 = vmax.f32 %v2846_v30, 0.0  ;;  %v4110_v49 = vpack.c.bf16 %v2888_v52, %v2887_v27 }
 0x32c   : > { %v4104_v18 = vpack.c.bf16 %v2886_v58, %v2885_v7  ;;  %v3517_v7 = vld [vmem:[%s5580_s7 + $0x8] sm:$0xff] }
 0x32e   : > { %4928 = vmatmul.mubr.msk.bf16.gmra.mxu0 %vm6514_vm8, %v4104_v18 }
 0x32f   : > { %4066 = vmatmul.mubr.msk.bf16.gmra.mxu1 %vm6400_vm2, %v6405_v1  ;;  %4931 = vmatprep.mubr.msk.bf16.mxu0 %vm6519_vm14, %v4110_v49 }
 0x330   : > { %4069 = vmatprep.mubr.msk.bf16.mxu1 %vm6431_vm6, %v6436_v60 }
 0x336   : > { %4932 = vmatmul.mubr.bf16.gmra.mxu0 %v6814_v40 }
 0x337   : > { %4072 = vmatmul.mubr.msk.bf16.gmra.mxu1 %vm6409_vm3, %v6397_v47 }
 0x338   : > { %4075 = vmatprep.mubr.msk.bf16.mxu1 %vm6440_vm7, %v6428_v9 }
 0x33f   : > { %4078 = vmatmul.mubr.msk.bf16.gmra.mxu1 %vm6431_vm6, %v6436_v60 }
 0x340   : > { %4081 = vmatprep.mubr.msk.bf16.mxu1 %vm6463_vm10, %v4080_v33 }
 0x347   : > { %4084 = vmatmul.mubr.msk.bf16.gmra.mxu1 %vm6440_vm7, %v6428_v9 }
 0x348   : > { %4087 = vmatprep.mubr.msk.bf16.mxu1 %vm6470_vm11, %v6460_v31 }
 0x34f   : > { %4090 = vmatmul.mubr.msk.bf16.gmra.mxu1 %vm6463_vm10, %v4080_v33  ;;  %v3516_v33 = vld [vmem:[%s5580_s7] sm:$0xff] }
 0x350   : > { %4093 = vmatprep.mubr.msk.bf16.mxu1 %vm6490_vm13, %v4092_v15 }
 0x357   : > { %4096 = vmatmul.mubr.msk.bf16.gmra.mxu1 %vm6470_vm11, %v6460_v31 }
 0x358   : > { %4099 = vmatprep.mubr.msk.bf16.mxu1 %vm6497_vm0, %v4098_v48 }
 0x35f   : > { %4102 = vmatmul.mubr.msk.bf16.gmra.mxu1 %vm6490_vm13, %v4092_v15 }
 0x360   : > { %4105 = vmatprep.mubr.msk.bf16.mxu1 %vm6514_vm8, %v4104_v18 }
 0x367   : > { %4108 = vmatmul.mubr.msk.bf16.gmra.mxu1 %vm6497_vm0, %v4098_v48 }
 0x368   : > { %4111 = vmatprep.mubr.msk.bf16.mxu1 %vm6519_vm14, %v4110_v49 }
 0x36f   : > { %4114 = vmatmul.mubr.msk.bf16.gmra.mxu1 %vm6514_vm8, %v4104_v18 }
 0x3b7   : > { %v4527_v47 = vpop.f32.mrf.mxu1 }
 0x3b9   : > { %v4528_v54 = vpop.f32.mrf.mxu1 }
 0x3ba   : > { %v4529_v55 = vadd.f32 %v4528_v54, %v4527_v47 }
 0x3bb   : > { %v4530_v1 = vpop.f32.mrf.mxu1 }
 0x3bd   : > { %v4531_v32 = vpop.f32.mrf.mxu1 }
 0x3be   : > { %v4905_v9 = vpop.f32.mrf.mxu0  ;;  %v4532_v46 = vadd.f32 %v4531_v32, %v4530_v1 }
 0x3bf   : > { %v4533_v60 = vpop.f32.mrf.mxu1 }
 0x3c0   : > { %v3357_v14 = vpop.f32.mrf.mxu0 }
 0x3c1   : > { %v3358_v31 = vadd.f32 %v4529_v55, %v3357_v14  ;;  %v4534_v44 = vpop.f32.mrf.mxu1  ;;  %v3520_v55 = vld [vmem:[%s5580_s7 + $0x20] sm:$0xff] }
 0x3c2   : > { %v4535_v41 = vadd.f32 %v4534_v44, %v4533_v60  ;;  %v4906_v48 = vpop.f32.mrf.mxu0 }
 0x3c3   : > { %v3484_v15 = vadd.f32 %v3358_v31, %v6196_v2  ;;  %v4536_v53 = vpop.f32.mrf.mxu1 }
 0x3c4   : > { %v3366_v4 = vadd.f32 %v4905_v9, %v4535_v41  ;;  %v3360_v28 = vpop.f32.mrf.mxu0 }
 0x3c5   : > { %v3548_v19 = vadd.f32 %v3516_v33, %v3484_v15  ;;  %v3361_v23 = vadd.f32 %v4532_v46, %v3360_v28  ;;  %v4537_v27 = vpop.f32.mrf.mxu1 }
 0x3c6   : > { %v3486_v26 = vadd.f32 %v3366_v4, %v6193_v61  ;;  %v4538_v52 = vadd.f32 %v4537_v27, %v4536_v53  ;;  %v4909_v30 = vpop.f32.mrf.mxu0  ;;  %v3519_v61 = vld [vmem:[%s5580_s7 + $0x18] sm:$0xff] }
 0x3c7   : > { %3580 = vst [vmem:[%s6577_s16] sm:$0xff] %v3548_v19  ;;  %v3485_v2 = vadd.f32 %v3361_v23, %v6203_v3  ;;  %v4539_v58 = vpop.f32.mrf.mxu1  ;;  %v3522_v23 = vld [vmem:[%s5580_s7 + $0x30] sm:$0xff] }
 0x3c8   : > { %v3550_v49 = vadd.f32 %v3518_v29, %v3486_v26  ;;  %v3369_v21 = vadd.f32 %v4906_v48, %v4538_v52  ;;  %v3373_v18 = vpop.f32.mrf.mxu0  ;;  %v3521_v48 = vld [vmem:[%s5580_s7 + $0x28] sm:$0xff] }
 0x3c9   : > { %v3549_v62 = vadd.f32 %v3517_v7, %v3485_v2  ;;  %v4540_v40 = vpop.f32.mrf.mxu1 }
 0x3ca   : > { %3582 = vst [vmem:[%s6577_s16 + $0x10] sm:$0xff] %v3550_v49  ;;  %v3487_v47 = vadd.f32 %v3369_v21, %v6200_v45  ;;  %v4541_v54 = vadd.f32 %v4540_v40, %v4539_v58  ;;  %v4910_v1 = vpop.f32.mrf.mxu0  ;;  %v3523_v49 = vld [vmem:[%s5580_s7 + $0x38] sm:$0xff] }
 0x3cb   : > { %3581 = vst [vmem:[%s6577_s16 + $0x8] sm:$0xff] %v3549_v62  ;;  %v4542_v32 = vpop.f32.mrf.mxu1 }
 0x3cc   : > { %v3551_v9 = vadd.f32 %v3519_v61, %v3487_v47  ;;  %v3374_v3 = vadd.f32 %v4541_v54, %v3373_v18  ;;  %v3376_v14 = vpop.f32.mrf.mxu0  ;;  %v3524_v47 = vld [vmem:[%s5580_s7 + $0x40] sm:$0xff] }
 0x3cd   : > { %v4543_v60 = vpop.f32.mrf.mxu1 }
 0x3ce   : > { %3583 = vst [vmem:[%s6577_s16 + $0x18] sm:$0xff] %v3551_v9  ;;  %v3488_v31 = vadd.f32 %v3374_v3, %v6212_v24  ;;  %v4544_v44 = vadd.f32 %v4543_v60, %v4542_v32  ;;  %v4913_v15 = vpop.f32.mrf.mxu0  ;;  %v3525_v60 = vld [vmem:[%s5580_s7 + $0x48] sm:$0xff] }
 0x3cf   : > { %v4545_v33 = vpop.f32.mrf.mxu1 }
 0x3d0   : > { %v3552_v41 = vadd.f32 %v3520_v55, %v3488_v31  ;;  %v3377_v45 = vadd.f32 %v4544_v44, %v3376_v14  ;;  %v3389_v24 = vpop.f32.mrf.mxu0 }
 0x3d1   : > { %v4546_v46 = vpop.f32.mrf.mxu1 }
 0x3d2   : > { %3584 = vst [vmem:[%s6577_s16 + $0x20] sm:$0xff] %v3552_v41  ;;  %v3489_v53 = vadd.f32 %v3377_v45, %v6220_v6  ;;  %v4547_v4 = vadd.f32 %v4546_v46, %v4545_v33  ;;  %v4914_v6 = vpop.f32.mrf.mxu0 }
 0x3d3   : > { %v4548_v28 = vpop.f32.mrf.mxu1 }
 0x3d4   : > { %v3553_v19 = vadd.f32 %v3521_v48, %v3489_v53  ;;  %v3382_v29 = vadd.f32 %v4909_v30, %v4547_v4  ;;  %v3526_v48 = vld [vmem:[%s5580_s7 + $0x50] sm:$0xff] }
 0x3d5   : > { %v4549_v27 = vpop.f32.mrf.mxu1 }
 0x3d6   : > { %3585 = vst [vmem:[%s6577_s16 + $0x28] sm:$0xff] %v3553_v19  ;;  %v3490_v26 = vadd.f32 %v3382_v29, %v6207_v22  ;;  %v4550_v7 = vadd.f32 %v4549_v27, %v4548_v28  ;;  %v3392_v22 = vpop.f32.mrf.mxu0 }
 0x3d7   : > { %v4551_v52 = vpop.f32.mrf.mxu1 }
 0x3d8   : > { %v3554_v2 = vadd.f32 %v3522_v23, %v3490_v26  ;;  %v3385_v58 = vadd.f32 %v4910_v1, %v4550_v7  ;;  %v3527_v23 = vld [vmem:[%s5580_s7 + $0x58] sm:$0xff] }
 0x3d9   : > { %v4552_v21 = vpop.f32.mrf.mxu1 }
 0x3da   : > { %3586 = vst [vmem:[%s6577_s16 + $0x30] sm:$0xff] %v3554_v2  ;;  %v3491_v18 = vadd.f32 %v3385_v58, %v6216_v43  ;;  %v4553_v30 = vadd.f32 %v4552_v21, %v4551_v52  ;;  %v4917_v43 = vpop.f32.mrf.mxu0  ;;  %v3528_v2 = vld [vmem:[%s5580_s7 + $0x60] sm:$0xff] }
 0x3db   : > { %v4554_v62 = vpop.f32.mrf.mxu1 }
 0x3dc   : > { %v3555_v61 = vadd.f32 %v3523_v49, %v3491_v18  ;;  %v3390_v40 = vadd.f32 %v4553_v30, %v3389_v24 }
 0x3dd   : > { %v4555_v54 = vpop.f32.mrf.mxu1 }
 0x3de   : > { %3587 = vst [vmem:[%s6577_s16 + $0x38] sm:$0xff] %v3555_v61  ;;  %v3492_v32 = vadd.f32 %v3390_v40, %v6225_v39  ;;  %v4556_v1 = vadd.f32 %v4555_v54, %v4554_v62  ;;  %v3405_v39 = vpop.f32.mrf.mxu0  ;;  %v3529_v62 = vld [vmem:[%s5580_s7 + $0x68] sm:$0xff] }
 0x3df   : > { %v4557_v9 = vpop.f32.mrf.mxu1 }
 0x3e0   : > { %v3556_v3 = vadd.f32 %v3524_v47, %v3492_v32  ;;  %v3393_v55 = vadd.f32 %v4556_v1, %v3392_v22  ;;  %v3530_v1 = vld [vmem:[%s5580_s7 + $0x70] sm:$0xff] }
 0x3e1   : > { %v4558_v14 = vpop.f32.mrf.mxu1 }
 0x3e2   : > { %3588 = vst [vmem:[%s6577_s16 + $0x40] sm:$0xff] %v3556_v3  ;;  %v3493_v31 = vadd.f32 %v3393_v55, %v6231_v37  ;;  %v4559_v44 = vadd.f32 %v4558_v14, %v4557_v9  ;;  %v4918_v37 = vpop.f32.mrf.mxu0 }
 0x3e3   : > { %v4560_v33 = vpop.f32.mrf.mxu1 }
 0x3e4   : > { %v3557_v41 = vadd.f32 %v3525_v60, %v3493_v31  ;;  %v3398_v45 = vadd.f32 %v4913_v15, %v4559_v44  ;;  %v3531_v44 = vld [vmem:[%s5580_s7 + $0x78] sm:$0xff] }
 0x3e5   : > { %v4561_v46 = vpop.f32.mrf.mxu1 }
 0x3e6   : > { %3589 = vst [vmem:[%s6577_s16 + $0x48] sm:$0xff] %v3557_v41  ;;  %v3494_v53 = vadd.f32 %v3398_v45, %v6222_v36  ;;  %v4562_v4 = vadd.f32 %v4561_v46, %v4560_v33  ;;  %v3408_v36 = vpop.f32.mrf.mxu0 }
 0x3e7   : > { %v4563_v28 = vpop.f32.mrf.mxu1 }
 0x3e8   : > { %v3558_v19 = vadd.f32 %v3526_v48, %v3494_v53  ;;  %v3401_v29 = vadd.f32 %v4914_v6, %v4562_v4 }
 0x3e9   : > { %v4564_v27 = vpop.f32.mrf.mxu1 }
 0x3ea   : > { %3590 = vst [vmem:[%s6577_s16 + $0x50] sm:$0xff] %v3558_v19  ;;  %v3495_v24 = vadd.f32 %v3401_v29, %v6228_v63  ;;  %v4565_v15 = vadd.f32 %v4564_v27, %v4563_v28  ;;  %v4921_v63 = vpop.f32.mrf.mxu0  ;;  %v3533_v27 = vld [vmem:[%s5580_s7 + $0x88] sm:$0xff] }
 0x3eb   : > { %v4566_v26 = vpop.f32.mrf.mxu1 }
 0x3ec   : > { %v3559_v7 = vadd.f32 %v3527_v23, %v3495_v24  ;;  %v3406_v52 = vadd.f32 %v4565_v15, %v3405_v39  ;;  %v3532_v39 = vld [vmem:[%s5580_s7 + $0x80] sm:$0xff] }
 0x3ed   : > { %v4567_v58 = vpop.f32.mrf.mxu1 }
 0x3ee   : > { %3591 = vst [vmem:[%s6577_s16 + $0x58] sm:$0xff] %v3559_v7  ;;  %v3496_v49 = vadd.f32 %v3406_v52, %v6239_v5  ;;  %v4568_v21 = vadd.f32 %v4567_v58, %v4566_v26  ;;  %v3421_v5 = vpop.f32.mrf.mxu0 }
 0x3ef   : > { %v4569_v6 = vpop.f32.mrf.mxu1 }
 0x3f0   : > { %v3560_v18 = vadd.f32 %v3528_v2, %v3496_v49  ;;  %v3409_v30 = vadd.f32 %v4568_v21, %v3408_v36  ;;  %v3534_v2 = vld [vmem:[%s5580_s7 + $0x90] sm:$0xff] }
 0x3f1   : > { %v4570_v61 = vpop.f32.mrf.mxu1 }
 0x3f2   : > { %3592 = vst [vmem:[%s6577_s16 + $0x60] sm:$0xff] %v3560_v18  ;;  %v3497_v40 = vadd.f32 %v3409_v30, %v6246_v8  ;;  %v4571_v47 = vadd.f32 %v4570_v61, %v4569_v6  ;;  %v4922_v8 = vpop.f32.mrf.mxu0  ;;  %v3535_v30 = vld [vmem:[%s5580_s7 + $0x98] sm:$0xff] }
 0x3f3   : > { %v4572_v54 = vpop.f32.mrf.mxu1 }
 0x3f4   : > { %v3561_v22 = vadd.f32 %v3529_v62, %v3497_v40  ;;  %v3414_v32 = vadd.f32 %v4917_v43, %v4571_v47 }
 0x3f5   : > { %v4573_v9 = vpop.f32.mrf.mxu1 }
 0x3f6   : > { %3593 = vst [vmem:[%s6577_s16 + $0x68] sm:$0xff] %v3561_v22  ;;  %v3498_v3 = vadd.f32 %v3414_v32, %v6234_v35  ;;  %v4574_v55 = vadd.f32 %v4573_v9, %v4572_v54  ;;  %v3424_v35 = vpop.f32.mrf.mxu0  ;;  %v3536_v22 = vld [vmem:[%s5580_s7 + $0xa0] sm:$0xff] }
 0x3f7   : > { %v4575_v60 = vpop.f32.mrf.mxu1 }
 0x3f8   : > { %v3562_v14 = vadd.f32 %v3530_v1, %v3498_v3  ;;  %v3417_v31 = vadd.f32 %v4918_v37, %v4574_v55 }
 0x3f9   : > { %v4576_v33 = vpop.f32.mrf.mxu1 }
 0x3fa   : > { %3594 = vst [vmem:[%s6577_s16 + $0x70] sm:$0xff] %v3562_v14  ;;  %v3499_v41 = vadd.f32 %v3417_v31, %v6242_v20  ;;  %v4577_v43 = vadd.f32 %v4576_v33, %v4575_v60  ;;  %v4925_v20 = vpop.f32.mrf.mxu0  ;;  %v3537_v60 = vld [vmem:[%s5580_s7 + $0xa8] sm:$0xff] }
 0x3fb   : > { %v4578_v45 = vpop.f32.mrf.mxu1 }
 0x3fc   : > { %v3563_v48 = vadd.f32 %v3531_v44, %v3499_v41  ;;  %v3422_v46 = vadd.f32 %v4577_v43, %v3421_v5  ;;  %v3538_v43 = vld [vmem:[%s5580_s7 + $0xb0] sm:$0xff] }
 0x3fd   : > { %v4579_v53 = vpop.f32.mrf.mxu1 }
 0x3fe   : > { %3595 = vst [vmem:[%s6577_s16 + $0x78] sm:$0xff] %v3563_v48  ;;  %v3500_v4 = vadd.f32 %v3422_v46, %v6250_v17  ;;  %v4580_v28 = vadd.f32 %v4579_v53, %v4578_v45  ;;  %v3437_v17 = vpop.f32.mrf.mxu0 }
 0x3ff   : > { %v4581_v19 = vpop.f32.mrf.mxu1 }
 0x400   : > { %v3564_v29 = vadd.f32 %v3532_v39, %v3500_v4  ;;  %v3425_v23 = vadd.f32 %v4580_v28, %v3424_v35  ;;  %v3539_v4 = vld [vmem:[%s5580_s7 + $0xb8] sm:$0xff] }
 0x401   : > { %v4582_v37 = vpop.f32.mrf.mxu1 }
 0x402   : > { %3596 = vst [vmem:[%s6577_s16 + $0x80] sm:$0xff] %v3564_v29  ;;  %v3501_v24 = vadd.f32 %v3425_v23, %v6255_v42  ;;  %v4583_v15 = vadd.f32 %v4582_v37, %v4581_v19  ;;  %v4926_v42 = vpop.f32.mrf.mxu0 }
 0x403   : > { %v4584_v26 = vpop.f32.mrf.mxu1 }
 0x404   : > { %v3565_v7 = vadd.f32 %v3533_v27, %v3501_v24  ;;  %v3430_v52 = vadd.f32 %v4921_v63, %v4583_v15 }
 0x405   : > { %v4585_v58 = vpop.f32.mrf.mxu1 }
 0x406   : > { %3597 = vst [vmem:[%s6577_s16 + $0x88] sm:$0xff] %v3565_v7  ;;  %v3502_v36 = vadd.f32 %v3430_v52, %v6248_v11  ;;  %v4586_v49 = vadd.f32 %v4585_v58, %v4584_v26  ;;  %v3440_v11 = vpop.f32.mrf.mxu0  ;;  %v3541_v58 = vld [vmem:[%s5580_s7 + $0xc8] sm:$0xff] }
 0x407   : > { %v4587_v21 = vpop.f32.mrf.mxu1 }
 0x408   : > { %v3566_v6 = vadd.f32 %v3534_v2, %v3502_v36  ;;  %v3433_v18 = vadd.f32 %v4922_v8, %v4586_v49 }
 0x409   : > { %v4588_v62 = vpop.f32.mrf.mxu1 }
 0x40a   : > { %3598 = vst [vmem:[%s6577_s16 + $0x90] sm:$0xff] %v3566_v6  ;;  %v3503_v61 = vadd.f32 %v3433_v18, %v6253_v59  ;;  %v4589_v63 = vadd.f32 %v4588_v62, %v4587_v21  ;;  %v4929_v59 = vpop.f32.mrf.mxu0 }
 0x40b   : > { %v4590_v40 = vpop.f32.mrf.mxu1 }
 0x40c   : > { %v3567_v47 = vadd.f32 %v3535_v30, %v3503_v61  ;;  %v3438_v54 = vadd.f32 %v4589_v63, %v3437_v17  ;;  %v3542_v30 = vld [vmem:[%s5580_s7 + $0xd0] sm:$0xff] }
 0x40d   : > { %v4591_v32 = vpop.f32.mrf.mxu1 }
 0x40e   : > { %3599 = vst [vmem:[%s6577_s16 + $0x98] sm:$0xff] %v3567_v47  ;;  %v3504_v1 = vadd.f32 %v3438_v54, %v6260_v0  ;;  %v4592_v9 = vadd.f32 %v4591_v32, %v4590_v40  ;;  %v3453_v0 = vpop.f32.mrf.mxu0  ;;  %v3543_v54 = vld [vmem:[%s5580_s7 + $0xd8] sm:$0xff] }
 0x40f   : > { %v4593_v5 = vpop.f32.mrf.mxu1 }
 0x410   : > { %v3568_v3 = vadd.f32 %v3536_v22, %v3504_v1  ;;  %v3441_v55 = vadd.f32 %v4592_v9, %v3440_v11 }
 0x411   : > { %v4594_v14 = vpop.f32.mrf.mxu1 }
 0x412   : > { %3600 = vst [vmem:[%s6577_s16 + $0xa0] sm:$0xff] %v3568_v3  ;;  %v3505_v31 = vadd.f32 %v3441_v55, %v6267_v10  ;;  %v4595_v44 = vadd.f32 %v4594_v14, %v4593_v5  ;;  %v4930_v10 = vpop.f32.mrf.mxu0  ;;  %v3544_v3 = vld [vmem:[%s5580_s7 + $0xe0] sm:$0xff] }
 0x413   : > { %v4596_v33 = vpop.f32.mrf.mxu1 }
 0x414   : > { %v3569_v8 = vadd.f32 %v3537_v60, %v3505_v31  ;;  %v3446_v41 = vadd.f32 %v4925_v20, %v4595_v44  ;;  %v3540_v20 = vld [vmem:[%s5580_s7 + $0xc0] sm:$0xff] }
 0x415   : > { %v4597_v45 = vpop.f32.mrf.mxu1 }
 0x416   : > { %3601 = vst [vmem:[%s6577_s16 + $0xa8] sm:$0xff] %v3569_v8  ;;  %v3506_v48 = vadd.f32 %v3446_v41, %v6258_v38  ;;  %v4598_v46 = vadd.f32 %v4597_v45, %v4596_v33  ;;  %v3456_v38 = vpop.f32.mrf.mxu0  ;;  %v3545_v33 = vld [vmem:[%s5580_s7 + $0xe8] sm:$0xff] }
 0x417   : > { %v4599_v39 = vpop.f32.mrf.mxu1 }
 0x418   : > { %v3570_v53 = vadd.f32 %v3538_v43, %v3506_v48  ;;  %v3449_v35 = vadd.f32 %v4926_v42, %v4598_v46  ;;  %v3546_v48 = vld [vmem:[%s5580_s7 + $0xf0] sm:$0xff] }
 0x419   : > { %v4600_v28 = vpop.f32.mrf.mxu1 }
 0x41a   : > { %3602 = vst [vmem:[%s6577_s16 + $0xb0] sm:$0xff] %v3570_v53  ;;  %v3507_v19 = vadd.f32 %v3449_v35, %v6263_v56  ;;  %v4601_v29 = vadd.f32 %v4600_v28, %v4599_v39  ;;  %v4933_v56 = vpop.f32.mrf.mxu0 }
 0x41b   : > { %v4602_v23 = vpop.f32.mrf.mxu1 }
 0x41c   : > { %v3571_v27 = vadd.f32 %v3539_v4, %v3507_v19  ;;  %v3454_v37 = vadd.f32 %v4601_v29, %v3453_v0  ;;  %v3547_v4 = vld [vmem:[%s5580_s7 + $0xf8] sm:$0xff] }
 0x41d   : > { %v4603_v24 = vpop.f32.mrf.mxu1 }
 0x41e   : > { %3603 = vst [vmem:[%s6577_s16 + $0xb8] sm:$0xff] %v3571_v27  ;;  %v3508_v15 = vadd.f32 %v3454_v37, %v6269_v16  ;;  %v4604_v26 = vadd.f32 %v4603_v24, %v4602_v23  ;;  %v3469_v16 = vpop.f32.mrf.mxu0 }
 0x41f   : > { %v4605_v7 = vpop.f32.mrf.mxu1 }
 0x420   : > { %v3572_v52 = vadd.f32 %v3540_v20, %v3508_v15  ;;  %v3457_v2 = vadd.f32 %v4604_v26, %v3456_v38 }
 0x421   : > { %v4606_v17 = vpop.f32.mrf.mxu1 }
 0x422   : > { %3604 = vst [vmem:[%s6577_s16 + $0xc0] sm:$0xff] %v3572_v52  ;;  %v3509_v36 = vadd.f32 %v3457_v2, %v6274_v25  ;;  %v4607_v49 = vadd.f32 %v4606_v17, %v4605_v7  ;;  %v4934_v25 = vpop.f32.mrf.mxu0 }
 0x423   : > { %v4608_v21 = vpop.f32.mrf.mxu1 }
 0x424   : > { %v3573_v6 = vadd.f32 %v3541_v58, %v3509_v36  ;;  %v3462_v18 = vadd.f32 %v4929_v59, %v4607_v49 }
 0x425   : > { %v4609_v62 = vpop.f32.mrf.mxu1 }
 0x426   : > { %3605 = vst [vmem:[%s6577_s16 + $0xc8] sm:$0xff] %v3573_v6  ;;  %v3510_v42 = vadd.f32 %v3462_v18, %v6272_v13  ;;  %v4610_v61 = vadd.f32 %v4609_v62, %v4608_v21  ;;  %v3472_v13 = vpop.f32.mrf.mxu0 }
 0x427   : > { %v4611_v63 = vpop.f32.mrf.mxu1 }
 0x428   : > { %v3574_v40 = vadd.f32 %v3542_v30, %v3510_v42  ;;  %v3465_v47 = vadd.f32 %v4930_v10, %v4610_v61 }
 0x429   : > { %v4612_v22 = vpop.f32.mrf.mxu1 }
 0x42a   : > { %3606 = vst [vmem:[%s6577_s16 + $0xd0] sm:$0xff] %v3574_v40  ;;  %v3511_v32 = vadd.f32 %v3465_v47, %v6277_v50  ;;  %v4613_v11 = vadd.f32 %v4612_v22, %v4611_v63 }
 0x42b   : > { %v4614_v1 = vpop.f32.mrf.mxu1 }
 0x42c   : > { %v3575_v9 = vadd.f32 %v3543_v54, %v3511_v32  ;;  %v3470_v5 = vadd.f32 %v4613_v11, %v3469_v16 }
 0x42d   : > { %v4615_v55 = vpop.f32.mrf.mxu1 }
 0x42e   : > { %3607 = vst [vmem:[%s6577_s16 + $0xd8] sm:$0xff] %v3575_v9  ;;  %v3512_v60 = vadd.f32 %v3470_v5, %v6283_v57  ;;  %v4616_v14 = vadd.f32 %v4615_v55, %v4614_v1 }
 0x42f   : > { %v4617_v59 = vpop.f32.mrf.mxu1 }
 0x430   : > { %v3576_v31 = vadd.f32 %v3544_v3, %v3512_v60  ;;  %v3473_v44 = vadd.f32 %v4616_v14, %v3472_v13 }
 0x431   : > { %v4618_v50 = vpop.f32.mrf.mxu1 }
 0x432   : > { %3608 = vst [vmem:[%s6577_s16 + $0xe0] sm:$0xff] %v3576_v31  ;;  %v3513_v8 = vadd.f32 %v3473_v44, %v6286_v12  ;;  %v4619_v41 = vadd.f32 %v4618_v50, %v4617_v59 }
 0x433   : > { %v4620_v43 = vpop.f32.mrf.mxu1 }
 0x434   : > { %v3577_v45 = vadd.f32 %v3545_v33, %v3513_v8  ;;  %v3478_v0 = vadd.f32 %v4933_v56, %v4619_v41 }
 0x435   : > { %v4621_v57 = vpop.f32.mrf.mxu1 }
 0x436   : > { %3609 = vst [vmem:[%s6577_s16 + $0xe8] sm:$0xff] %v3577_v45  ;;  %v3514_v46 = vadd.f32 %v3478_v0, %v6297_v51  ;;  %v4622_v39 = vadd.f32 %v4621_v57, %v4620_v43 }
 0x438   : > { %v3578_v53 = vadd.f32 %v3546_v48, %v3514_v46  ;;  %v3481_v35 = vadd.f32 %v4934_v25, %v4622_v39 }
 0x43a   : > { %3610 = vst [vmem:[%s6577_s16 + $0xf0] sm:$0xff] %v3578_v53  ;;  %v3515_v12 = vadd.f32 %v3481_v35, %v6314_v34 }
 0x43c   : > { %v3579_v51 = vadd.f32 %v3547_v4, %v3515_v12 }
 0x43e   : > { %3611 = vst [vmem:[%s6577_s16 + $0xf8] sm:$0xff] %v3579_v51 }
 0x43f   : > { %5276 = shalt.err (!%p5273_p4)
}
 0x440   : > { %s5277_s2 = scalar_lea.hbm %s6674_s4, 4096  ;;  %s5281_s7 = scalar_lea.hbm %s6725_s5, 8192 }
 0x441   : > { %p5278_p5 = scmp.ne.s32.totalorder %s6674_s4, %s5277_s2  ;;  %p5282_p11 = scmp.lt.s32.totalorder %s6674_s4, %s6725_s5 }
 0x442   : > { %p5283_p6 = scmp.lt.s32.totalorder %s5281_s7, %s5277_s2 }
 0x443   : > { %p5279_p7 = pnand %p5278_p5, %p6815_p10 }
 0x444   : > { %p5284_p12 = por %p5283_p6, %p5282_p11 }
 0x445   : > { %p5280_p8 = pneg %p5279_p7 }
 0x447   : > { %p5285_p0 = pnand %p5284_p12, %p5280_p8 }
 0x449   : > { %5288 = shalt.err (!%p5285_p0)
}
 0x44a   : > { %s5352_s12 = smov 128   ;;  %s5353_s14 = smov 8  }
 0x44b   : > { %4950 = dma.vmem_to_hbm [thread:$0]  (%p6815_p10), %s6676_s8, 4096, %s6674_s4, %s3613_s11, %s5352_s12, %s5352_s12, %s5353_s14  }
 0x44c PF: > { %s3641_s16 = sand.u32 1, %s5327_s18   ;;  %p6816_p3 = scmp.ne.s32.totalorder %s6735_s25, 0 }
 0x44d   : > { %p6817_p2 = scmp.ge.s32.totalorder %s5339_s21, 2  ;;  %s3642_s0 = scalar_lea.sflag [#allocation4], %s3641_s16 }
 0x44f   : > { %p4967_p9 = pnand %p6817_p2, %p6816_p3 }
 0x451   : > { %p4968_p13 = pneg %p4967_p9 }
 0x453   : > { %5322 = dma.done.wait (%p4968_p13), %s3642_s0, 4096  }
 0x454   : > { %5324 = vsyncadd (%p4968_p13), %s3642_s0, 4294963200  ;;  %p22_p1 = scmp.ge.s32.totalorder %s5462_s15, 4   ;;  %s6818_s18 = smov %s5331_s19 }
 0x455   : > { %s6819_s19 = smov %s5335_s20  ;;  %s6820_s20 = smov %s5478_s27 }
 0x456   : > { %s6821_s21 = smov %s5462_s15  ;;  %24 = sbr.rel (!%p22_p1) target bundleno = 12 (0xc), region = 108 }
 0x45b   :  { %3647 = vsyncpa [#allocation3], 1 }
 0x45c   :  { %3649 = vsyncpa [#allocation3 + $0x1], 1 }
 0x45d   :  { %3650 = vsyncpa [#allocation6], 1 }
 0x45e   :  { %3652 = vsyncpa [#allocation6 + $0x1], 1 }
 0x45f   :  { %3653 = vsyncpa [#allocation9], 1 }
 0x460   :  { %3654 = vsyncpa [#allocation4], 1 }
 0x461   :  { %3656 = vsyncpa [#allocation4 + $0x1], 1 }

</bundles_post_ra>
